<compile_context>
chip_gen: v5e
topology: v5e:2x2
jax: 0.10.0
libtpu: 0.0.40
codegen_flags: <defaults>
</compile_context>

<pallas_src>
import functools

import jax
import jax.numpy as jnp
from jax.experimental import pallas as pl
from jax.experimental.pallas import tpu as pltpu

HIDDEN_PAD = 128  # all trunk / head widths padded to one lane-dense vreg width


def mlp_disentangle_kernel(
    x_ref,                 # (TB, 2352) input tile, narrow dtype (bf16/int8) or f32
    w1_ref, b1_ref,        # (2352, 128), (1, 128) -- W1 pre-scaled by 1/255, padded 100->128
    w2_ref, b2_ref,        # (128, 128), (1, 128)  -- padded 100->128
    w3_ref, b3_ref,        # (128, 128), (1, 128)  -- padded 16->128
    wh_ref, bh_ref,        # (128, 128), (1, 128)  -- fused heads: cols 0:16 target, 16:32 bias
    wc_ref, bc_ref,        # (128, 128), (1, 128)  -- block-diag classifiers, cols 0:nc / nc:2nc
    out_ref,               # (TB, 128) fused logits (lane-dense; sliced in wrapper)
):
    # Up-cast the narrow input tile to the layer-1 weight dtype in VMEM: a few
    # hundred VPU cycles vs. the microseconds of HBM DMA the narrow dtype saves.
    x = x_ref[...].astype(w1_ref.dtype)
    # shared feature trunk (Linear -> ReLU x3); 1/255 is folded into w1
    h = jnp.maximum(jnp.dot(x, w1_ref[...], preferred_element_type=jnp.float32) + b1_ref[...], 0.0)
    h = jnp.maximum(jnp.dot(h, w2_ref[...], preferred_element_type=jnp.float32) + b2_ref[...], 0.0)
    h = jnp.maximum(jnp.dot(h, w3_ref[...], preferred_element_type=jnp.float32) + b3_ref[...], 0.0)
    # fused task heads (target | bias) -> ReLU
    f = jnp.maximum(jnp.dot(h, wh_ref[...], preferred_element_type=jnp.float32) + bh_ref[...], 0.0)
    # fused block-diagonal classifiers (no activation), lane-dense store
    out_ref[...] = jnp.dot(f, wc_ref[...], preferred_element_type=jnp.float32) + bc_ref[...]


def init_params(key, num_classes=10):
    """PyTorch-default-like Linear init; weights stored as (in, out), biases (1, out)."""
    dims = [
        (3 * 28 * 28, 100),  # feature[0]
        (100, 100),          # feature[2]
        (100, 16),           # feature[4]
        (16, 16),            # task_head_target
        (16, 16),            # task_head_bias
        (16, num_classes),   # fc_target
        (16, num_classes),   # fc_bias
    ]
    params = []
    for fan_in, fan_out in dims:
        key, kw, kb = jax.random.split(key, 3)
        bound = 1.0 / jnp.sqrt(jnp.float32(fan_in))
        w = jax.random.uniform(kw, (fan_in, fan_out), jnp.float32, -bound, bound)
        b = jax.random.uniform(kb, (1, fan_out), jnp.float32, -bound, bound)
        params.append((w, b))
    return params


def _pad2d(a, rows, cols):
    r, c = a.shape
    return jnp.pad(a, ((0, rows - r), (0, cols - c)))


def _round_up(n, m):
    return ((n + m - 1) // m) * m


def pack_params(params, num_classes, w1_dtype=jnp.float32):
    """Fold 1/255 into W1, zero-pad widths to 128, fuse heads and classifiers.

    Call ONCE at model-init time and pass the returned tuple to the forward
    (hoisted out of the jitted forward per perf review).  w1_dtype=jnp.bfloat16
    is recommended on v5e (makes the big matmul cleanly DMA-bound) at ~0.4%
    relative rounding on layer 1.
    """
    (w1, b1), (w2, b2), (w3, b3), (wt, bt), (wbs, bbs), (wft, bft), (wfb, bfb) = params
    H = HIDDEN_PAD
    assert 2 * num_classes <= H

    w1p = _pad2d(w1 * (1.0 / 255.0), w1.shape[0], H).astype(w1_dtype)
    b1p = _pad2d(b1, 1, H)
    w2p = _pad2d(w2, H, H)
    b2p = _pad2d(b2, 1, H)
    w3p = _pad2d(w3, H, H)
    b3p = _pad2d(b3, 1, H)

    # fused heads: feat[:, :16] = target head, feat[:, 16:32] = bias head
    wh = jnp.zeros((H, H), jnp.float32)
    wh = wh.at[:16, :16].set(wt)
    wh = wh.at[:16, 16:32].set(wbs)
    bh = jnp.zeros((1, H), jnp.float32)
    bh = bh.at[:, :16].set(bt[0])
    bh = bh.at[:, 16:32].set(bbs[0])

    # block-diagonal classifiers: out[:, :nc] = fc_target, out[:, nc:2nc] = fc_bias
    wc = jnp.zeros((H, H), jnp.float32)
    wc = wc.at[:16, :num_classes].set(wft)
    wc = wc.at[16:32, num_classes:2 * num_classes].set(wfb)
    bc = jnp.zeros((1, H), jnp.float32)
    bc = bc.at[:, :num_classes].set(bft[0])
    bc = bc.at[:, num_classes:2 * num_classes].set(bfb[0])

    return (w1p, b1p, w2p, b2p, w3p, b3p, wh, bh, wc, bc)


@functools.partial(jax.jit, static_argnames=("num_classes", "tb", "vmem_limit_bytes"))
def mlp_disentangle_forward(x_nchw, packed, num_classes=10, tb=1024,
                            vmem_limit_bytes=32 << 20):
    """Equivalent of MLP_DISENTANGLE_SHENG.forward(x) -> (final_x_target, final_x_bias).

    `packed` is the tuple returned by pack_params (pre-packed once at init).
    Pass x as bf16 (or uint8) to avoid any wrapper-side cast; pixel data in
    [0, 255] is exact in bf16.
    """
    B = x_nchw.shape[0]
    x_flat = x_nchw.reshape(B, -1)            # contiguous view, no HBM copy
    if x_flat.dtype.itemsize > 2:
        # Narrow wide inputs on the way in; kernel up-casts in VMEM.
        x_flat = x_flat.astype(jnp.bfloat16)
    D = x_flat.shape[1]
    H = HIDDEN_PAD

    # sublane alignment for the batch-tile dim: f32 -> 8, bf16 -> 16, int8 -> 32
    sub = max(8, 32 // x_flat.dtype.itemsize)

    # Derive the batch tile from B so padding is <= sub-1 rows (not up to TB-1),
    # and force >=2 grid steps when the batch allows so the "parallel" batch
    # axis actually feeds both v7x TensorCores.
    n_steps = max(1, -(-B // tb))
    if n_steps == 1 and B >= 2 * sub:
        n_steps = 2
    TB = _round_up(-(-B // n_steps), sub)
    Bp = TB * n_steps
    if Bp != B:
        x_flat = jnp.pad(x_flat, ((0, Bp - B), (0, 0)))
    grid = (n_steps,)

    x_spec = pl.BlockSpec((TB, D), lambda i: (i, 0))
    # Constant index_map -> weights stay resident in VMEM across grid steps.
    w_specs = [pl.BlockSpec(p.shape, lambda i: (0, 0)) for p in packed]
    out_spec = pl.BlockSpec((TB, H), lambda i: (i, 0))

    flops = 2 * Bp * (D * H + 4 * H * H)
    bytes_accessed = (Bp * D * x_flat.dtype.itemsize
                      + sum(int(p.size) * p.dtype.itemsize for p in packed)
                      + Bp * H * 4)

    fn = pl.pallas_call(
        mlp_disentangle_kernel,
        out_shape=jax.ShapeDtypeStruct((Bp, H), jnp.float32),
        grid=grid,
        in_specs=[x_spec] + w_specs,
        out_specs=out_spec,
        compiler_params=pltpu.CompilerParams(
            dimension_semantics=("parallel",),   # megacore split on v7x
            vmem_limit_bytes=vmem_limit_bytes,   # <=32 MiB keeps v7x (64 MiB phys) safe
        ),
        cost_estimate=pl.CostEstimate(
            flops=flops, transcendentals=0, bytes_accessed=bytes_accessed),
    )
    out = fn(x_flat, *packed)

    final_x_target = out[:B, :num_classes]
    final_x_bias = out[:B, num_classes:2 * num_classes]
    return final_x_target, final_x_bias


def reference_forward(x_nchw_f32, params):
    """Pure-JAX reference matching the PyTorch module exactly."""
    B = x_nchw_f32.shape[0]
    x = x_nchw_f32.reshape(B, -1).astype(jnp.float32) / 255.0
    (w1, b1), (w2, b2), (w3, b3), (wt, bt), (wbs, bbs), (wft, bft), (wfb, bfb) = params
    h = jnp.maximum(x @ w1 + b1, 0.0)
    h = jnp.maximum(h @ w2 + b2, 0.0)
    h = jnp.maximum(h @ w3 + b3, 0.0)
    ft = jnp.maximum(h @ wt + bt, 0.0)
    fb = jnp.maximum(h @ wbs + bbs, 0.0)
    return ft @ wft + bft, fb @ wfb + bfb


if __name__ == "__main__":
    num_classes = 10
    batch = 2

    key = jax.random.PRNGKey(0)
    key, kx = jax.random.split(key)
    # Integer "pixel" data in [0, 255] (NCHW, like the PyTorch module expects).
    # Integers 0..255 are exactly representable in bf16, so the narrow input
    # dtype (the main bandwidth optimization) is bit-exact here.
    x_int = jax.random.randint(kx, (batch, 3, 28, 28), 0, 256, dtype=jnp.int32)
    x = x_int.astype(jnp.bfloat16)

    params = init_params(jax.random.PRNGKey(0), num_classes=num_classes)
    packed = pack_params(params, num_classes)   # packed once at init time

    out_target, out_bias = mlp_disentangle_forward(x, packed, num_classes=num_classes)
    out_target = jax.block_until_ready(out_target)
    out_bias = jax.block_until_ready(out_bias)

    ref_target, ref_bias = reference_forward(x_int.astype(jnp.float32), params)
    assert out_target.shape == (batch, num_classes)
    assert out_bias.shape == (batch, num_classes)
    assert jnp.allclose(out_target, ref_target, atol=1e-4, rtol=1e-4)
    assert jnp.allclose(out_bias, ref_bias, atol=1e-4, rtol=1e-4)

    print("KERNEL_OK")
</pallas_src>

<mosaic_0001>
module attributes {stable_mosaic.version = 11 : i64} {
  func.func @mlp_disentangle_kernel(%arg0: i32, %arg1: memref<16x2352xbf16, #tpu.memory_space<vmem>>, %arg2: memref<2352x128xf32, #tpu.memory_space<vmem>>, %arg3: memref<1x128xf32, #tpu.memory_space<vmem>>, %arg4: memref<128x128xf32, #tpu.memory_space<vmem>>, %arg5: memref<1x128xf32, #tpu.memory_space<vmem>>, %arg6: memref<128x128xf32, #tpu.memory_space<vmem>>, %arg7: memref<1x128xf32, #tpu.memory_space<vmem>>, %arg8: memref<128x128xf32, #tpu.memory_space<vmem>>, %arg9: memref<1x128xf32, #tpu.memory_space<vmem>>, %arg10: memref<128x128xf32, #tpu.memory_space<vmem>>, %arg11: memref<1x128xf32, #tpu.memory_space<vmem>>, %arg12: memref<16x128xf32, #tpu.memory_space<vmem>>) attributes {dimension_semantics = [#tpu.dimension_semantics<parallel>], iteration_bounds = array<i64: 1>, scalar_prefetch = 0 : i64, scratch_operands = 0 : i64, tpu.core_type = #tpu.core_type<tc>, window_params = [{transform_indices = @transform_0, window_bounds = array<i64: 16, 2352>}, {pipeline_mode = #tpu.pipeline_mode<synchronous>, transform_indices = @transform_1, window_bounds = array<i64: 2352, 128>}, {pipeline_mode = #tpu.pipeline_mode<synchronous>, transform_indices = @transform_2, window_bounds = array<i64: 1, 128>}, {pipeline_mode = #tpu.pipeline_mode<synchronous>, transform_indices = @transform_3, window_bounds = array<i64: 128, 128>}, {pipeline_mode = #tpu.pipeline_mode<synchronous>, transform_indices = @transform_4, window_bounds = array<i64: 1, 128>}, {pipeline_mode = #tpu.pipeline_mode<synchronous>, transform_indices = @transform_5, window_bounds = array<i64: 128, 128>}, {pipeline_mode = #tpu.pipeline_mode<synchronous>, transform_indices = @transform_6, window_bounds = array<i64: 1, 128>}, {pipeline_mode = #tpu.pipeline_mode<synchronous>, transform_indices = @transform_7, window_bounds = array<i64: 128, 128>}, {pipeline_mode = #tpu.pipeline_mode<synchronous>, transform_indices = @transform_8, window_bounds = array<i64: 1, 128>}, {pipeline_mode = #tpu.pipeline_mode<synchronous>, transform_indices = @transform_9, window_bounds = array<i64: 128, 128>}, {pipeline_mode = #tpu.pipeline_mode<synchronous>, transform_indices = @transform_10, window_bounds = array<i64: 1, 128>}, {transform_indices = @transform_11, window_bounds = array<i64: 16, 128>}]} {
    %c0 = arith.constant 0 : index
    %c0_0 = arith.constant 0 : index
    %0 = vector.load %arg1[%c0, %c0_0] : memref<16x2352xbf16, #tpu.memory_space<vmem>>, vector<16x2352xbf16>
    %1 = arith.extf %0 : vector<16x2352xbf16> to vector<16x2352xf32>
    %c0_1 = arith.constant 0 : index
    %c0_2 = arith.constant 0 : index
    %2 = vector.load %arg2[%c0_1, %c0_2] : memref<2352x128xf32, #tpu.memory_space<vmem>>, vector<2352x128xf32>
    %cst = arith.constant dense<0.000000e+00> : vector<16x128xf32>
    %3 = tpu.matmul %1, %2, %cst {dimension_numbers = #tpu.dot_dimension_numbers<[1], [0], [0], [1], [0, 0, 1, 1], [], []>} : vector<16x2352xf32>, vector<2352x128xf32>, vector<16x128xf32> -> vector<16x128xf32>
    %c0_3 = arith.constant 0 : index
    %c0_4 = arith.constant 0 : index
    %4 = vector.load %arg3[%c0_3, %c0_4] : memref<1x128xf32, #tpu.memory_space<vmem>>, vector<1x128xf32>
    %5 = vector.broadcast %4 : vector<1x128xf32> to vector<16x128xf32>
    %6 = arith.addf %3, %5 : vector<16x128xf32>
    %cst_5 = arith.constant 0.000000e+00 : f32
    %7 = vector.broadcast %cst_5 : f32 to vector<16x128xf32>
    %8 = arith.maximumf %6, %7 : vector<16x128xf32>
    %c0_6 = arith.constant 0 : index
    %c0_7 = arith.constant 0 : index
    %9 = vector.load %arg4[%c0_6, %c0_7] : memref<128x128xf32, #tpu.memory_space<vmem>>, vector<128x128xf32>
    %cst_8 = arith.constant dense<0.000000e+00> : vector<16x128xf32>
    %10 = tpu.matmul %8, %9, %cst_8 {dimension_numbers = #tpu.dot_dimension_numbers<[1], [0], [0], [1], [0, 0, 1, 1], [], []>} : vector<16x128xf32>, vector<128x128xf32>, vector<16x128xf32> -> vector<16x128xf32>
    %c0_9 = arith.constant 0 : index
    %c0_10 = arith.constant 0 : index
    %11 = vector.load %arg5[%c0_9, %c0_10] : memref<1x128xf32, #tpu.memory_space<vmem>>, vector<1x128xf32>
    %12 = vector.broadcast %11 : vector<1x128xf32> to vector<16x128xf32>
    %13 = arith.addf %10, %12 : vector<16x128xf32>
    %cst_11 = arith.constant 0.000000e+00 : f32
    %14 = vector.broadcast %cst_11 : f32 to vector<16x128xf32>
    %15 = arith.maximumf %13, %14 : vector<16x128xf32>
    %c0_12 = arith.constant 0 : index
    %c0_13 = arith.constant 0 : index
    %16 = vector.load %arg6[%c0_12, %c0_13] : memref<128x128xf32, #tpu.memory_space<vmem>>, vector<128x128xf32>
    %cst_14 = arith.constant dense<0.000000e+00> : vector<16x128xf32>
    %17 = tpu.matmul %15, %16, %cst_14 {dimension_numbers = #tpu.dot_dimension_numbers<[1], [0], [0], [1], [0, 0, 1, 1], [], []>} : vector<16x128xf32>, vector<128x128xf32>, vector<16x128xf32> -> vector<16x128xf32>
    %c0_15 = arith.constant 0 : index
    %c0_16 = arith.constant 0 : index
    %18 = vector.load %arg7[%c0_15, %c0_16] : memref<1x128xf32, #tpu.memory_space<vmem>>, vector<1x128xf32>
    %19 = vector.broadcast %18 : vector<1x128xf32> to vector<16x128xf32>
    %20 = arith.addf %17, %19 : vector<16x128xf32>
    %cst_17 = arith.constant 0.000000e+00 : f32
    %21 = vector.broadcast %cst_17 : f32 to vector<16x128xf32>
    %22 = arith.maximumf %20, %21 : vector<16x128xf32>
    %c0_18 = arith.constant 0 : index
    %c0_19 = arith.constant 0 : index
    %23 = vector.load %arg8[%c0_18, %c0_19] : memref<128x128xf32, #tpu.memory_space<vmem>>, vector<128x128xf32>
    %cst_20 = arith.constant dense<0.000000e+00> : vector<16x128xf32>
    %24 = tpu.matmul %22, %23, %cst_20 {dimension_numbers = #tpu.dot_dimension_numbers<[1], [0], [0], [1], [0, 0, 1, 1], [], []>} : vector<16x128xf32>, vector<128x128xf32>, vector<16x128xf32> -> vector<16x128xf32>
    %c0_21 = arith.constant 0 : index
    %c0_22 = arith.constant 0 : index
    %25 = vector.load %arg9[%c0_21, %c0_22] : memref<1x128xf32, #tpu.memory_space<vmem>>, vector<1x128xf32>
    %26 = vector.broadcast %25 : vector<1x128xf32> to vector<16x128xf32>
    %27 = arith.addf %24, %26 : vector<16x128xf32>
    %cst_23 = arith.constant 0.000000e+00 : f32
    %28 = vector.broadcast %cst_23 : f32 to vector<16x128xf32>
    %29 = arith.maximumf %27, %28 : vector<16x128xf32>
    %c0_24 = arith.constant 0 : index
    %c0_25 = arith.constant 0 : index
    %30 = vector.load %arg10[%c0_24, %c0_25] : memref<128x128xf32, #tpu.memory_space<vmem>>, vector<128x128xf32>
    %cst_26 = arith.constant dense<0.000000e+00> : vector<16x128xf32>
    %31 = tpu.matmul %29, %30, %cst_26 {dimension_numbers = #tpu.dot_dimension_numbers<[1], [0], [0], [1], [0, 0, 1, 1], [], []>} : vector<16x128xf32>, vector<128x128xf32>, vector<16x128xf32> -> vector<16x128xf32>
    %c0_27 = arith.constant 0 : index
    %c0_28 = arith.constant 0 : index
    %32 = vector.load %arg11[%c0_27, %c0_28] : memref<1x128xf32, #tpu.memory_space<vmem>>, vector<1x128xf32>
    %33 = vector.broadcast %32 : vector<1x128xf32> to vector<16x128xf32>
    %34 = arith.addf %31, %33 : vector<16x128xf32>
    %c0_29 = arith.constant 0 : index
    %c0_30 = arith.constant 0 : index
    %35 = vector.load %arg12[%c0_29, %c0_30] : memref<16x128xf32, #tpu.memory_space<vmem>>, vector<16x128xf32>
    tpu.vector_store %arg12[%c0_29, %c0_30], %34 {strides = array<i32>} : memref<16x128xf32, #tpu.memory_space<vmem>>, vector<16x128xf32>,
    return
  }
  func.func @transform_0(%arg0: i32) -> (i32, i32) {
    %c0_i32 = arith.constant 0 : i32
    %c0_i32_0 = arith.constant 0 : i32
    return %arg0, %c0_i32 : i32, i32
  }
  func.func @transform_1(%arg0: i32) -> (i32, i32) {
    %c0_i32 = arith.constant 0 : i32
    %c0_i32_0 = arith.constant 0 : i32
    %c0_i32_1 = arith.constant 0 : i32
    return %c0_i32, %c0_i32_0 : i32, i32
  }
  func.func @transform_2(%arg0: i32) -> (i32, i32) {
    %c0_i32 = arith.constant 0 : i32
    %c0_i32_0 = arith.constant 0 : i32
    %c0_i32_1 = arith.constant 0 : i32
    return %c0_i32, %c0_i32_0 : i32, i32
  }
  func.func @transform_3(%arg0: i32) -> (i32, i32) {
    %c0_i32 = arith.constant 0 : i32
    %c0_i32_0 = arith.constant 0 : i32
    %c0_i32_1 = arith.constant 0 : i32
    return %c0_i32, %c0_i32_0 : i32, i32
  }
  func.func @transform_4(%arg0: i32) -> (i32, i32) {
    %c0_i32 = arith.constant 0 : i32
    %c0_i32_0 = arith.constant 0 : i32
    %c0_i32_1 = arith.constant 0 : i32
    return %c0_i32, %c0_i32_0 : i32, i32
  }
  func.func @transform_5(%arg0: i32) -> (i32, i32) {
    %c0_i32 = arith.constant 0 : i32
    %c0_i32_0 = arith.constant 0 : i32
    %c0_i32_1 = arith.constant 0 : i32
    return %c0_i32, %c0_i32_0 : i32, i32
  }
  func.func @transform_6(%arg0: i32) -> (i32, i32) {
    %c0_i32 = arith.constant 0 : i32
    %c0_i32_0 = arith.constant 0 : i32
    %c0_i32_1 = arith.constant 0 : i32
    return %c0_i32, %c0_i32_0 : i32, i32
  }
  func.func @transform_7(%arg0: i32) -> (i32, i32) {
    %c0_i32 = arith.constant 0 : i32
    %c0_i32_0 = arith.constant 0 : i32
    %c0_i32_1 = arith.constant 0 : i32
    return %c0_i32, %c0_i32_0 : i32, i32
  }
  func.func @transform_8(%arg0: i32) -> (i32, i32) {
    %c0_i32 = arith.constant 0 : i32
    %c0_i32_0 = arith.constant 0 : i32
    %c0_i32_1 = arith.constant 0 : i32
    return %c0_i32, %c0_i32_0 : i32, i32
  }
  func.func @transform_9(%arg0: i32) -> (i32, i32) {
    %c0_i32 = arith.constant 0 : i32
    %c0_i32_0 = arith.constant 0 : i32
    %c0_i32_1 = arith.constant 0 : i32
    return %c0_i32, %c0_i32_0 : i32, i32
  }
  func.func @transform_10(%arg0: i32) -> (i32, i32) {
    %c0_i32 = arith.constant 0 : i32
    %c0_i32_0 = arith.constant 0 : i32
    %c0_i32_1 = arith.constant 0 : i32
    return %c0_i32, %c0_i32_0 : i32, i32
  }
  func.func @transform_11(%arg0: i32) -> (i32, i32) {
    %c0_i32 = arith.constant 0 : i32
    %c0_i32_0 = arith.constant 0 : i32
    return %arg0, %c0_i32 : i32, i32
  }
}

</mosaic_0001>

<bundles_post_ra>
// kernel: mlp_disentangle_forward.1
= control target key start
LH: loop header
LB: loop body
LE: loop exit
PB: predicated region body
PF: predicated region fallthrough
CT: control target
= control target key end

     0   :  { %16 = vsyncpa [#allocation3], 0  ;;  %s1648_s0 = inlined_call_operand.vmem [shape: bf16[16,2352], index: 0, kind: input, shape index: {}]   ;;  %s1649_s1 = inlined_call_operand.hbm [shape: f32[2352,128], index: 1, kind: input, shape index: {}]   ;;  %s1650_s2 = inlined_call_operand.hbm [shape: f32[1,128], index: 2, kind: input, shape index: {}]   ;;  %s1651_s3 = inlined_call_operand.hbm [shape: f32[128,128], index: 3, kind: input, shape index: {}]   ;;  %s1652_s4 = inlined_call_operand.hbm [shape: f32[1,128], index: 4, kind: input, shape index: {}]   ;;  %s1653_s5 = inlined_call_operand.hbm [shape: f32[128,128], index: 5, kind: input, shape index: {}]   ;;  %s1654_s6 = inlined_call_operand.hbm [shape: f32[1,128], index: 6, kind: input, shape index: {}]   ;;  %s1655_s7 = inlined_call_operand.hbm [shape: f32[128,128], index: 7, kind: input, shape index: {}]   ;;  %s1656_s8 = inlined_call_operand.hbm [shape: f32[1,128], index: 8, kind: input, shape index: {}]   ;;  %s1657_s9 = inlined_call_operand.hbm [shape: f32[128,128], index: 9, kind: input, shape index: {}]   ;;  %s1658_s10 = inlined_call_operand.hbm [shape: f32[1,128], index: 10, kind: input, shape index: {}]   ;;  %s1659_s11 = inlined_call_operand.vmem [shape: f32[16,128], index: 11, kind: output, shape index: {}]  }
   0x1   :  { %17 = vsyncpa [#allocation5], 0 }
   0x2   :  { %18 = vsyncpa [#allocation8], 0 }
   0x3   :  { %19 = vsyncpa [#allocation11], 0 }
   0x4   :  { %20 = vsyncpa [#allocation14], 0  ;;  %s42_s19 = sshll.u32 %s1650_s2, 4  ;;  %s43_s19 = int_to_ptr.hbm [resolvable:$true] %s42_s19 }
   0x5   :  { %21 = vsyncpa [#allocation17], 0  ;;  %s1463_s20 = smov [#allocation4]   ;;  %s66_s24 = sshll.u32 %s1652_s4, 4  ;;  %s67_s24 = int_to_ptr.hbm [resolvable:$true] %s66_s24 }
   0x6   :  { %s44_s21 = sshll.u32 %s1463_s20, 4  ;;  %s1464_s25 = smov [#allocation7]   ;;  %s45_s21 = int_to_ptr.vmem [resolvable:$true] %s44_s21 }
   0x7   :  { %47 = dma.hbm_to_vmem [thread:$0]  %s43_s19, 16, %s45_s21, [#allocation5]  }
   0x8   :  { %s68_s26 = sshll.u32 %s1464_s25, 4  ;;  %s90_s29 = sshll.u32 %s1654_s6, 4  ;;  %s69_s26 = int_to_ptr.vmem [resolvable:$true] %s68_s26  ;;  %s91_s29 = int_to_ptr.hbm [resolvable:$true] %s90_s29 }
   0x9   :  { %71 = dma.hbm_to_vmem [thread:$0]  %s67_s24, 16, %s69_s26, [#allocation8]  }
   0xa   :  { %s114_s12 = sshll.u32 %s1656_s8, 4  ;;  %s1465_s13 = smov [#allocation10]   ;;  %s115_s12 = int_to_ptr.hbm [resolvable:$true] %s114_s12 }
   0xb   :  { %s92_s14 = sshll.u32 %s1465_s13, 4  ;;  %s1466_s4 = smov [#allocation13]   ;;  %s93_s14 = int_to_ptr.vmem [resolvable:$true] %s92_s14 }
   0xc   :  { %95 = dma.hbm_to_vmem [thread:$0]  %s91_s29, 16, %s93_s14, [#allocation11]  }
   0xd   :  { %s116_s15 = sshll.u32 %s1466_s4, 4  ;;  %s28_s18 = sshll.u32 %s1649_s1, 4  ;;  %s117_s15 = int_to_ptr.vmem [resolvable:$true] %s116_s15  ;;  %s29_s18 = int_to_ptr.hbm [resolvable:$true] %s28_s18 }
   0xe   :  { %119 = dma.hbm_to_vmem [thread:$0]  %s115_s12, 16, %s117_s15, [#allocation14]  }
   0xf   :  { %s1467_s6 = smov [#allocation2]   ;;  %s52_s8 = sshll.u32 %s1651_s3, 4  ;;  %s53_s8 = int_to_ptr.hbm [resolvable:$true] %s52_s8 }
  0x10   :  { %s30_s19 = sshll.u32 %s1467_s6, 4  ;;  %s1468_s22 = smov 128   ;;  %s31_s19 = int_to_ptr.vmem [resolvable:$true] %s30_s19 }
  0x11   :  { %s1469_s23 = smov 8   ;;  %s1470_s24 = smov [#allocation6]  }
  0x12   :  { %36 = dma.hbm_to_vmem [thread:$0]  %s29_s18, 37632, %s31_s19, [#allocation3], %s1468_s22, %s1468_s22, %s1469_s23  }
  0x13   :  { %s54_s25 = sshll.u32 %s1470_s24, 4  ;;  %s76_s27 = sshll.u32 %s1653_s5, 4  ;;  %s55_s25 = int_to_ptr.vmem [resolvable:$true] %s54_s25  ;;  %s77_s27 = int_to_ptr.hbm [resolvable:$true] %s76_s27 }
  0x14   :  { %60 = dma.hbm_to_vmem [thread:$0]  %s53_s8, 2048, %s55_s25, [#allocation5], %s1468_s22, %s1468_s22, %s1469_s23  }
  0x15   :  { %s100_s29 = sshll.u32 %s1655_s7, 4  ;;  %s1471_s2 = smov [#allocation9]   ;;  %s101_s29 = int_to_ptr.hbm [resolvable:$true] %s100_s29 }
  0x16   :  { %s78_s30 = sshll.u32 %s1471_s2, 4  ;;  %s1472_s12 = smov [#allocation12]   ;;  %s79_s30 = int_to_ptr.vmem [resolvable:$true] %s78_s30 }
  0x17   :  { %84 = dma.hbm_to_vmem [thread:$0]  %s77_s27, 2048, %s79_s30, [#allocation8], %s1468_s22, %s1468_s22, %s1469_s23  }
  0x18   :  { %s102_s5 = sshll.u32 %s1472_s12, 4  ;;  %s124_s4 = sshll.u32 %s1657_s9, 4  ;;  %s103_s5 = int_to_ptr.vmem [resolvable:$true] %s102_s5  ;;  %s125_s4 = int_to_ptr.hbm [resolvable:$true] %s124_s4 }
  0x19   :  { %108 = dma.hbm_to_vmem [thread:$0]  %s101_s29, 2048, %s103_s5, [#allocation11], %s1468_s22, %s1468_s22, %s1469_s23  }
  0x1a   :  { %s138_s16 = sshll.u32 %s1658_s10, 4  ;;  %s1473_s17 = smov [#allocation15]   ;;  %s139_s16 = int_to_ptr.hbm [resolvable:$true] %s138_s16 }
  0x1b   :  { %s126_s18 = sshll.u32 %s1473_s17, 4  ;;  %s1474_s6 = smov [#allocation16]   ;;  %s127_s18 = int_to_ptr.vmem [resolvable:$true] %s126_s18 }
  0x1c   :  { %132 = dma.hbm_to_vmem [thread:$0]  %s125_s4, 2048, %s127_s18, [#allocation14], %s1468_s22, %s1468_s22, %s1469_s23  }
  0x1d   :  { %s140_s9 = sshll.u32 %s1474_s6, 4  ;;  %s141_s9 = int_to_ptr.vmem [resolvable:$true] %s140_s9 }
  0x1e   :  { %143 = dma.hbm_to_vmem [thread:$0]  %s139_s16, 16, %s141_s9, [#allocation17]  }
  0x1f   :  { %1451 = dma.done.wait [#allocation3], 37632  }
  0x20   :  { %1452 = vsyncadd [#allocation3], 4294929664 }
  0x21   :  { %1453 = dma.done.wait [#allocation5], 2064  }
  0x22   :  { %1454 = vsyncadd [#allocation5], 4294965232 }
  0x23   :  { %1455 = dma.done.wait [#allocation8], 2064  }
  0x24   :  { %1456 = vsyncadd [#allocation8], 4294965232 }
  0x25   :  { %1457 = dma.done.wait [#allocation11], 2064  }
  0x26   :  { %1458 = vsyncadd [#allocation11], 4294965232 }
  0x27   :  { %1459 = dma.done.wait [#allocation14], 2064  }
  0x28   :  { %1460 = vsyncadd [#allocation14], 4294965232 }
  0x29   :  { %1461 = dma.done.wait [#allocation17], 16  }
  0x2a   :  { %1462 = vsyncadd [#allocation17], 4294967280  ;;  %v257_v0 = vld [vmem:[#allocation2 + $0x78] sm:$0xff]  ;;  %v256_v2 = vld [vmem:[#allocation2 + $0x70] sm:$0xff]  ;;  %vm540_vm0 = vcmask 392192  }
  0x2b   :  { %v289_v1 = vld [vmem:[#allocation2 + $0x178] sm:$0xff]  ;;  %547 = vmatpush.msra.mxu0 %v257_v0  ;;  %v288_v4 = vld [vmem:[#allocation2 + $0x170] sm:$0xff]  ;;  %v255_v6 = vld [vmem:[#allocation2 + $0x68] sm:$0xff] }
  0x2c   :  { %593 = vmatpush.msra.mxu2 %v289_v1  ;;  %v273_v3 = vld [vmem:[#allocation2 + $0xf8] sm:$0xff]  ;;  %v272_v7 = vld [vmem:[#allocation2 + $0xf0] sm:$0xff]  ;;  %v287_v8 = vld [vmem:[#allocation2 + $0x168] sm:$0xff] }
  0x2d   :  { %v305_v5 = vld [vmem:[#allocation2 + $0x1f8] sm:$0xff]  ;;  %570 = vmatpush.msra.mxu1 %v273_v3  ;;  %548 = vmatpush.msra.mxu0 %v256_v2  ;;  %v304_v9 = vld [vmem:[#allocation2 + $0x1f0] sm:$0xff]  ;;  %v271_v10 = vld [vmem:[#allocation2 + $0xe8] sm:$0xff] }
  0x2e   :  { %616 = vmatpush.msra.mxu3 %v305_v5  ;;  %594 = vmatpush.msra.mxu2 %v288_v4  ;;  %v254_v11 = vld [vmem:[#allocation2 + $0x60] sm:$0xff]  ;;  %v303_v13 = vld [vmem:[#allocation2 + $0x1e8] sm:$0xff]  ;;  %v253_v16 = vld [vmem:[#allocation2 + $0x58] sm:$0xff] }
  0x2f   :  { %571 = vmatpush.msra.mxu1 %v272_v7  ;;  %v286_v12 = vld [vmem:[#allocation2 + $0x160] sm:$0xff]  ;;  %549 = vmatpush.msra.mxu0 %v255_v6  ;;  %v285_v17 = vld [vmem:[#allocation2 + $0x158] sm:$0xff]  ;;  %v252_v20 = vld [vmem:[#allocation2 + $0x50] sm:$0xff] }
  0x30   :  { %617 = vmatpush.msra.mxu3 %v304_v9  ;;  %595 = vmatpush.msra.mxu2 %v287_v8  ;;  %v270_v14 = vld [vmem:[#allocation2 + $0xe0] sm:$0xff]  ;;  %v269_v18 = vld [vmem:[#allocation2 + $0xd8] sm:$0xff]  ;;  %v284_v21 = vld [vmem:[#allocation2 + $0x150] sm:$0xff] }
  0x31   :  { %v302_v15 = vld [vmem:[#allocation2 + $0x1e0] sm:$0xff]  ;;  %572 = vmatpush.msra.mxu1 %v271_v10  ;;  %550 = vmatpush.msra.mxu0 %v254_v11  ;;  %v301_v19 = vld [vmem:[#allocation2 + $0x1d8] sm:$0xff]  ;;  %v268_v22 = vld [vmem:[#allocation2 + $0xd0] sm:$0xff] }
  0x32   :  { %618 = vmatpush.msra.mxu3 %v303_v13  ;;  %596 = vmatpush.msra.mxu2 %v286_v12  ;;  %v300_v23 = vld [vmem:[#allocation2 + $0x1d0] sm:$0xff]  ;;  %v251_v24 = vld [vmem:[#allocation2 + $0x48] sm:$0xff]  ;;  %v250_v28 = vld [vmem:[#allocation2 + $0x40] sm:$0xff] }
  0x33   :  { %573 = vmatpush.msra.mxu1 %v270_v14  ;;  %551 = vmatpush.msra.mxu0 %v253_v16  ;;  %v283_v25 = vld [vmem:[#allocation2 + $0x148] sm:$0xff]  ;;  %v282_v29 = vld [vmem:[#allocation2 + $0x140] sm:$0xff]  ;;  %v249_v32 = vld [vmem:[#allocation2 + $0x38] sm:$0xff] }
  0x34   :  { %619 = vmatpush.msra.mxu3 %v302_v15  ;;  %597 = vmatpush.msra.mxu2 %v285_v17  ;;  %v267_v26 = vld [vmem:[#allocation2 + $0xc8] sm:$0xff]  ;;  %v266_v30 = vld [vmem:[#allocation2 + $0xc0] sm:$0xff]  ;;  %v281_v33 = vld [vmem:[#allocation2 + $0x138] sm:$0xff] }
  0x35   :  { %574 = vmatpush.msra.mxu1 %v269_v18  ;;  %552 = vmatpush.msra.mxu0 %v252_v20  ;;  %v299_v27 = vld [vmem:[#allocation2 + $0x1c8] sm:$0xff]  ;;  %v298_v31 = vld [vmem:[#allocation2 + $0x1c0] sm:$0xff]  ;;  %v265_v34 = vld [vmem:[#allocation2 + $0xb8] sm:$0xff] }
  0x36   :  { %620 = vmatpush.msra.mxu3 %v301_v19  ;;  %598 = vmatpush.msra.mxu2 %v284_v21  ;;  %v297_v35 = vld [vmem:[#allocation2 + $0x1b8] sm:$0xff]  ;;  %v248_v36 = vld [vmem:[#allocation2 + $0x30] sm:$0xff]  ;;  %v247_v40 = vld [vmem:[#allocation2 + $0x28] sm:$0xff] }
  0x37   :  { %575 = vmatpush.msra.mxu1 %v268_v22  ;;  %553 = vmatpush.msra.mxu0 %v251_v24  ;;  %v280_v37 = vld [vmem:[#allocation2 + $0x130] sm:$0xff]  ;;  %v279_v41 = vld [vmem:[#allocation2 + $0x128] sm:$0xff]  ;;  %v246_v44 = vld [vmem:[#allocation2 + $0x20] sm:$0xff] }
  0x38   :  { %621 = vmatpush.msra.mxu3 %v300_v23  ;;  %599 = vmatpush.msra.mxu2 %v283_v25  ;;  %v264_v38 = vld [vmem:[#allocation2 + $0xb0] sm:$0xff]  ;;  %v263_v42 = vld [vmem:[#allocation2 + $0xa8] sm:$0xff]  ;;  %v278_v45 = vld [vmem:[#allocation2 + $0x120] sm:$0xff] }
  0x39   :  { %576 = vmatpush.msra.mxu1 %v267_v26  ;;  %554 = vmatpush.msra.mxu0 %v250_v28  ;;  %v296_v39 = vld [vmem:[#allocation2 + $0x1b0] sm:$0xff]  ;;  %v295_v43 = vld [vmem:[#allocation2 + $0x1a8] sm:$0xff]  ;;  %v262_v46 = vld [vmem:[#allocation2 + $0xa0] sm:$0xff] }
  0x3a   :  { %622 = vmatpush.msra.mxu3 %v299_v27  ;;  %600 = vmatpush.msra.mxu2 %v282_v29  ;;  %v294_v47 = vld [vmem:[#allocation2 + $0x1a0] sm:$0xff]  ;;  %v245_v48 = vld [vmem:[#allocation2 + $0x18] sm:$0xff]  ;;  %v244_v52 = vld [vmem:[#allocation2 + $0x10] sm:$0xff] }
  0x3b   :  { %577 = vmatpush.msra.mxu1 %v266_v30  ;;  %555 = vmatpush.msra.mxu0 %v249_v32  ;;  %v277_v49 = vld [vmem:[#allocation2 + $0x118] sm:$0xff]  ;;  %v276_v53 = vld [vmem:[#allocation2 + $0x110] sm:$0xff]  ;;  %v243_v56 = vld [vmem:[#allocation2 + $0x8] sm:$0xff] }
  0x3c   :  { %623 = vmatpush.msra.mxu3 %v298_v31  ;;  %601 = vmatpush.msra.mxu2 %v281_v33  ;;  %v261_v50 = vld [vmem:[#allocation2 + $0x98] sm:$0xff]  ;;  %v260_v54 = vld [vmem:[#allocation2 + $0x90] sm:$0xff]  ;;  %v275_v57 = vld [vmem:[#allocation2 + $0x108] sm:$0xff] }
  0x3d   :  { %578 = vmatpush.msra.mxu1 %v265_v34  ;;  %556 = vmatpush.msra.mxu0 %v248_v36  ;;  %v293_v51 = vld [vmem:[#allocation2 + $0x198] sm:$0xff]  ;;  %v292_v55 = vld [vmem:[#allocation2 + $0x190] sm:$0xff]  ;;  %v259_v58 = vld [vmem:[#allocation2 + $0x88] sm:$0xff] }
  0x3e   :  { %624 = vmatpush.msra.mxu3 %v297_v35  ;;  %602 = vmatpush.msra.mxu2 %v280_v37  ;;  %v291_v59 = vld [vmem:[#allocation2 + $0x188] sm:$0xff]  ;;  %v242_v60 = vld [vmem:[#allocation2] sm:$0xff]  ;;  %v321_v62 = vld [vmem:[#allocation2 + $0x278] sm:$0xff] }
  0x3f   :  { %579 = vmatpush.msra.mxu1 %v264_v38  ;;  %557 = vmatpush.msra.mxu0 %v247_v40  ;;  %v274_v61 = vld [vmem:[#allocation2 + $0x100] sm:$0xff]  ;;  %v353_v63 = vld [vmem:[#allocation2 + $0x378] sm:$0xff]  ;;  %v320_v2 = vld [vmem:[#allocation2 + $0x270] sm:$0xff] }
  0x40   :  { %625 = vmatpush.msra.mxu3 %v296_v39  ;;  %603 = vmatpush.msra.mxu2 %v279_v41  ;;  %v258_v0 = vld [vmem:[#allocation2 + $0x80] sm:$0xff]  ;;  %v337_v3 = vld [vmem:[#allocation2 + $0x2f8] sm:$0xff]  ;;  %v352_v4 = vld [vmem:[#allocation2 + $0x370] sm:$0xff] }
  0x41   :  { %580 = vmatpush.msra.mxu1 %v263_v42  ;;  %558 = vmatpush.msra.mxu0 %v246_v44  ;;  %v290_v1 = vld [vmem:[#allocation2 + $0x180] sm:$0xff]  ;;  %v369_v5 = vld [vmem:[#allocation2 + $0x3f8] sm:$0xff]  ;;  %v319_v6 = vld [vmem:[#allocation2 + $0x268] sm:$0xff] }
  0x42   :  { %626 = vmatpush.msra.mxu3 %v295_v43  ;;  %604 = vmatpush.msra.mxu2 %v278_v45  ;;  %v336_v7 = vld [vmem:[#allocation2 + $0x2f0] sm:$0xff]  ;;  %v351_v8 = vld [vmem:[#allocation2 + $0x368] sm:$0xff]  ;;  %v318_v10 = vld [vmem:[#allocation2 + $0x260] sm:$0xff] }
  0x43   :  { %581 = vmatpush.msra.mxu1 %v262_v46  ;;  %559 = vmatpush.msra.mxu0 %v245_v48  ;;  %v368_v9 = vld [vmem:[#allocation2 + $0x3f0] sm:$0xff]  ;;  %v335_v11 = vld [vmem:[#allocation2 + $0x2e8] sm:$0xff]  ;;  %v350_v12 = vld [vmem:[#allocation2 + $0x360] sm:$0xff] }
  0x44   :  { %627 = vmatpush.msra.mxu3 %v294_v47  ;;  %605 = vmatpush.msra.mxu2 %v277_v49  ;;  %v367_v13 = vld [vmem:[#allocation2 + $0x3e8] sm:$0xff]  ;;  %v317_v14 = vld [vmem:[#allocation2 + $0x258] sm:$0xff]  ;;  %v334_v15 = vld [vmem:[#allocation2 + $0x2e0] sm:$0xff] }
  0x45   :  { %582 = vmatpush.msra.mxu1 %v261_v50  ;;  %560 = vmatpush.msra.mxu0 %v244_v52  ;;  %v349_v16 = vld [vmem:[#allocation2 + $0x358] sm:$0xff]  ;;  %v366_v17 = vld [vmem:[#allocation2 + $0x3e0] sm:$0xff]  ;;  %v316_v18 = vld [vmem:[#allocation2 + $0x250] sm:$0xff] }
  0x46   :  { %628 = vmatpush.msra.mxu3 %v293_v51  ;;  %606 = vmatpush.msra.mxu2 %v276_v53  ;;  %v333_v19 = vld [vmem:[#allocation2 + $0x2d8] sm:$0xff]  ;;  %v348_v20 = vld [vmem:[#allocation2 + $0x350] sm:$0xff]  ;;  %v315_v22 = vld [vmem:[#allocation2 + $0x248] sm:$0xff] }
  0x47   :  { %583 = vmatpush.msra.mxu1 %v260_v54  ;;  %561 = vmatpush.msra.mxu0 %v243_v56  ;;  %v365_v21 = vld [vmem:[#allocation2 + $0x3d8] sm:$0xff]  ;;  %v332_v23 = vld [vmem:[#allocation2 + $0x2d0] sm:$0xff]  ;;  %v347_v24 = vld [vmem:[#allocation2 + $0x348] sm:$0xff] }
  0x48   :  { %629 = vmatpush.msra.mxu3 %v292_v55  ;;  %607 = vmatpush.msra.mxu2 %v275_v57  ;;  %v364_v25 = vld [vmem:[#allocation2 + $0x3d0] sm:$0xff]  ;;  %v314_v26 = vld [vmem:[#allocation2 + $0x240] sm:$0xff]  ;;  %v331_v27 = vld [vmem:[#allocation2 + $0x2c8] sm:$0xff] }
  0x49   :  { %584 = vmatpush.msra.mxu1 %v259_v58  ;;  %562 = vmatpush.msra.mxu0 %v242_v60  ;;  %v346_v28 = vld [vmem:[#allocation2 + $0x340] sm:$0xff]  ;;  %v363_v29 = vld [vmem:[#allocation2 + $0x3c8] sm:$0xff]  ;;  %v313_v30 = vld [vmem:[#allocation2 + $0x238] sm:$0xff] }
  0x4a   :  { %630 = vmatpush.msra.mxu3 %v291_v59  ;;  %608 = vmatpush.msra.mxu2 %v274_v61  ;;  %v330_v31 = vld [vmem:[#allocation2 + $0x2c0] sm:$0xff]  ;;  %v345_v32 = vld [vmem:[#allocation2 + $0x338] sm:$0xff]  ;;  %v312_v34 = vld [vmem:[#allocation2 + $0x230] sm:$0xff] }
  0x4b   :  { %639 = vmatpush.msrb.mxu0 %v321_v62  ;;  %585 = vmatpush.msra.mxu1 %v258_v0  ;;  %v362_v33 = vld [vmem:[#allocation2 + $0x3c0] sm:$0xff]  ;;  %v329_v35 = vld [vmem:[#allocation2 + $0x2b8] sm:$0xff]  ;;  %v185_v36 = vld [vmem:[%s1648_s0 + $0x8] sm:$0xff] }
  0x4c   :  { %685 = vmatpush.msrb.mxu2 %v353_v63  ;;  %631 = vmatpush.msra.mxu3 %v290_v1  ;;  %v344_v37 = vld [vmem:[#allocation2 + $0x330] sm:$0xff]  ;;  %v361_v38 = vld [vmem:[#allocation2 + $0x3b8] sm:$0xff]  ;;  %v311_v39 = vld [vmem:[#allocation2 + $0x228] sm:$0xff]  ;;  %v206_v44 = vunpack.c.l.bf16 %v185_v36  ;;  %v207_v50 = vunpack.c.h.bf16 %v185_v36 }
  0x4d   :  { %640 = vmatpush.msrb.mxu0 %v320_v2  ;;  %662 = vmatpush.msrb.mxu1 %v337_v3  ;;  %v328_v40 = vld [vmem:[#allocation2 + $0x2b0] sm:$0xff]  ;;  %v184_v41 = vld [vmem:[%s1648_s0] sm:$0xff]  ;;  %v343_v42 = vld [vmem:[#allocation2 + $0x328] sm:$0xff] }
  0x4e   :  { %686 = vmatpush.msrb.mxu2 %v352_v4  ;;  %708 = vmatpush.msrb.mxu3 %v369_v5  ;;  %v360_v43 = vld [vmem:[#allocation2 + $0x3b0] sm:$0xff]  ;;  %v310_v45 = vld [vmem:[#allocation2 + $0x220] sm:$0xff]  ;;  %v327_v46 = vld [vmem:[#allocation2 + $0x2a8] sm:$0xff]  ;;  %v204_v48 = vunpack.c.l.bf16 %v184_v41  ;;  %v205_v54 = vunpack.c.h.bf16 %v184_v41 }
  0x4f   :  { %641 = vmatpush.msrb.mxu0 %v319_v6  ;;  %663 = vmatpush.msrb.mxu1 %v336_v7  ;;  %v342_v47 = vld [vmem:[#allocation2 + $0x320] sm:$0xff]  ;;  %v359_v49 = vld [vmem:[#allocation2 + $0x3a8] sm:$0xff]  ;;  %v309_v51 = vld [vmem:[#allocation2 + $0x218] sm:$0xff] }
  0x50   :  { %687 = vmatpush.msrb.mxu2 %v351_v8  ;;  %709 = vmatpush.msrb.mxu3 %v368_v9  ;;  %v326_v52 = vld [vmem:[#allocation2 + $0x2a0] sm:$0xff]  ;;  %v341_v53 = vld [vmem:[#allocation2 + $0x318] sm:$0xff]  ;;  %v308_v56 = vld [vmem:[#allocation2 + $0x210] sm:$0xff] }
  0x51   :  { %642 = vmatpush.msrb.mxu0 %v318_v10  ;;  %664 = vmatpush.msrb.mxu1 %v335_v11  ;;  %v358_v55 = vld [vmem:[#allocation2 + $0x3a0] sm:$0xff]  ;;  %v325_v57 = vld [vmem:[#allocation2 + $0x298] sm:$0xff]  ;;  %v340_v59 = vld [vmem:[#allocation2 + $0x310] sm:$0xff] }
  0x52   :  { %688 = vmatpush.msrb.mxu2 %v350_v12  ;;  %710 = vmatpush.msrb.mxu3 %v367_v13  ;;  %v195_v58 = vld [vmem:[%s1648_s0 + $0x54] sm:$0xff]  ;;  %v307_v61 = vld [vmem:[#allocation2 + $0x208] sm:$0xff]  ;;  %v306_v3 = vld [vmem:[#allocation2 + $0x200] sm:$0xff] }
  0x53   :  { %643 = vmatpush.msrb.mxu0 %v317_v14  ;;  %665 = vmatpush.msrb.mxu1 %v334_v15  ;;  %v357_v60 = vld [vmem:[#allocation2 + $0x398] sm:$0xff]  ;;  %v324_v62 = vld [vmem:[#allocation2 + $0x290] sm:$0xff]  ;;  %v339_v0 = vld [vmem:[#allocation2 + $0x308] sm:$0xff]  ;;  %v225_v2 = vunpack.c.l.bf16 %v195_v58  ;;  %v226_v8 = vunpack.c.h.bf16 %v195_v58 }
  0x54   :  { %689 = vmatpush.msrb.mxu2 %v349_v16  ;;  %711 = vmatpush.msrb.mxu3 %v366_v17  ;;  %v194_v63 = vld [vmem:[%s1648_s0 + $0x4c] sm:$0xff]  ;;  %v338_v5 = vld [vmem:[#allocation2 + $0x300] sm:$0xff]  ;;  %v385_v9 = vld [vmem:[#allocation2 + $0x478] sm:$0xff] }
  0x55   :  { %644 = vmatpush.msrb.mxu0 %v316_v18  ;;  %666 = vmatpush.msrb.mxu1 %v333_v19  ;;  %v356_v1 = vld [vmem:[#allocation2 + $0x390] sm:$0xff]  ;;  %v323_v4 = vld [vmem:[#allocation2 + $0x288] sm:$0xff]  ;;  %v223_v6 = vunpack.c.l.bf16 %v194_v63  ;;  %v417_v10 = vld [vmem:[#allocation2 + $0x578] sm:$0xff]  ;;  %v224_v12 = vunpack.c.h.bf16 %v194_v63 }
  0x56   :  { %690 = vmatpush.msrb.mxu2 %v348_v20  ;;  %712 = vmatpush.msrb.mxu3 %v365_v21  ;;  %v355_v7 = vld [vmem:[#allocation2 + $0x388] sm:$0xff]  ;;  %v322_v11 = vld [vmem:[#allocation2 + $0x280] sm:$0xff]  ;;  %v384_v14 = vld [vmem:[#allocation2 + $0x470] sm:$0xff] }
  0x57   :  { %645 = vmatpush.msrb.mxu0 %v315_v22  ;;  %667 = vmatpush.msrb.mxu1 %v332_v23  ;;  %v354_v13 = vld [vmem:[#allocation2 + $0x380] sm:$0xff]  ;;  %v401_v15 = vld [vmem:[#allocation2 + $0x4f8] sm:$0xff]  ;;  %v416_v17 = vld [vmem:[#allocation2 + $0x570] sm:$0xff] }
  0x58   :  { %691 = vmatpush.msrb.mxu2 %v347_v24  ;;  %713 = vmatpush.msrb.mxu3 %v364_v25  ;;  %v187_v16 = vld [vmem:[%s1648_s0 + $0x18] sm:$0xff]  ;;  %v383_v19 = vld [vmem:[#allocation2 + $0x468] sm:$0xff]  ;;  %v400_v20 = vld [vmem:[#allocation2 + $0x4f0] sm:$0xff] }
  0x59   :  { %646 = vmatpush.msrb.mxu0 %v314_v26  ;;  %668 = vmatpush.msrb.mxu1 %v331_v27  ;;  %v433_v18 = vld [vmem:[#allocation2 + $0x5f8] sm:$0xff]  ;;  %v186_v21 = vld [vmem:[%s1648_s0 + $0x10] sm:$0xff]  ;;  %v415_v22 = vld [vmem:[#allocation2 + $0x568] sm:$0xff]  ;;  %v210_v24 = vunpack.c.l.bf16 %v187_v16 }
  0x5a   :  { %692 = vmatpush.msrb.mxu2 %v346_v28  ;;  %714 = vmatpush.msrb.mxu3 %v363_v29  ;;  %v432_v23 = vld [vmem:[#allocation2 + $0x5f0] sm:$0xff]  ;;  %v382_v25 = vld [vmem:[#allocation2 + $0x460] sm:$0xff]  ;;  %v399_v26 = vld [vmem:[#allocation2 + $0x4e8] sm:$0xff]  ;;  %v208_v28 = vunpack.c.l.bf16 %v186_v21 }
  0x5b   :  { %647 = vmatpush.msrb.mxu0 %v313_v30  ;;  %669 = vmatpush.msrb.mxu1 %v330_v31  ;;  %v414_v27 = vld [vmem:[#allocation2 + $0x560] sm:$0xff]  ;;  %v431_v29 = vld [vmem:[#allocation2 + $0x5e8] sm:$0xff]  ;;  %v211_v30 = vunpack.c.h.bf16 %v187_v16  ;;  %v381_v31 = vld [vmem:[#allocation2 + $0x458] sm:$0xff] }
  0x5c   :  { %693 = vmatpush.msrb.mxu2 %v345_v32  ;;  %715 = vmatpush.msrb.mxu3 %v362_v33  ;;  %v398_v32 = vld [vmem:[#allocation2 + $0x4e0] sm:$0xff]  ;;  %v413_v33 = vld [vmem:[#allocation2 + $0x558] sm:$0xff]  ;;  %v380_v36 = vld [vmem:[#allocation2 + $0x450] sm:$0xff] }
  0x5d   :  { %648 = vmatpush.msrb.mxu0 %v312_v34  ;;  %670 = vmatpush.msrb.mxu1 %v329_v35  ;;  %v209_v34 = vunpack.c.h.bf16 %v186_v21  ;;  %v430_v35 = vld [vmem:[#allocation2 + $0x5e0] sm:$0xff]  ;;  %v396_v41 = vld [vmem:[#allocation2 + $0x4d0] sm:$0xff]  ;;  %v391_v63 = vld [vmem:[#allocation2 + $0x4a8] sm:$0xff] }
  0x5e   :  { %694 = vmatpush.msrb.mxu2 %v344_v37  ;;  %716 = vmatpush.msrb.mxu3 %v361_v38  ;;  %v397_v37 = vld [vmem:[#allocation2 + $0x4d8] sm:$0xff]  ;;  %v412_v38 = vld [vmem:[#allocation2 + $0x550] sm:$0xff]  ;;  %v188_v16 = vld [vmem:[%s1648_s0 + $0x20] sm:$0xff] }
  0x5f   :  { %649 = vmatpush.msrb.mxu0 %v311_v39  ;;  %671 = vmatpush.msrb.mxu1 %v328_v40  ;;  %v429_v39 = vld [vmem:[#allocation2 + $0x5d8] sm:$0xff]  ;;  %v379_v40 = vld [vmem:[#allocation2 + $0x448] sm:$0xff] }
  0x60   :  { %695 = vmatpush.msrb.mxu2 %v343_v42  ;;  %717 = vmatpush.msrb.mxu3 %v360_v43  ;;  %v411_v42 = vld [vmem:[#allocation2 + $0x548] sm:$0xff]  ;;  %v428_v43 = vld [vmem:[#allocation2 + $0x5d0] sm:$0xff]  ;;  %v196_v58 = vld [vmem:[%s1648_s0 + $0x5c] sm:$0xff] }
  0x61   :  { %609 = vmatmul.f32.vlgmr.msra.gmra.mxu2 %v206_v44  ;;  %650 = vmatpush.msrb.mxu0 %v310_v45  ;;  %v378_v44 = vld [vmem:[#allocation2 + $0x440] sm:$0xff]  ;;  %v395_v45 = vld [vmem:[#allocation2 + $0x4c8] sm:$0xff] }
  0x62   :  { %672 = vmatpush.msrb.mxu1 %v327_v46  ;;  %696 = vmatpush.msrb.mxu2 %v342_v47  ;;  %v410_v46 = vld [vmem:[#allocation2 + $0x540] sm:$0xff]  ;;  %v427_v47 = vld [vmem:[#allocation2 + $0x5c8] sm:$0xff] }
  0x63   :  { %718 = vmatpush.msrb.mxu3 %v359_v49  ;;  %563 = vmatmul.f32.vlgmr.msra.gmra.mxu0 %v204_v48  ;;  %v377_v48 = vld [vmem:[#allocation2 + $0x438] sm:$0xff]  ;;  %v394_v49 = vld [vmem:[#allocation2 + $0x4c0] sm:$0xff]  ;;  %v387_v21 = vld [vmem:[#allocation2 + $0x488] sm:$0xff] }
  0x64   :  { %632 = vmatmul.f32.vlgmr.msra.gmra.mxu3 %v207_v50  ;;  %651 = vmatpush.msrb.mxu0 %v309_v51  ;;  %v409_v50 = vld [vmem:[#allocation2 + $0x538] sm:$0xff]  ;;  %v426_v51 = vld [vmem:[#allocation2 + $0x5c0] sm:$0xff] }
  0x65   :  { %673 = vmatpush.msrb.mxu1 %v326_v52  ;;  %697 = vmatpush.msrb.mxu2 %v341_v53  ;;  %v376_v52 = vld [vmem:[#allocation2 + $0x430] sm:$0xff]  ;;  %v393_v53 = vld [vmem:[#allocation2 + $0x4b8] sm:$0xff] }
  0x66   :  { %719 = vmatpush.msrb.mxu3 %v358_v55  ;;  %586 = vmatmul.f32.vlgmr.msra.gmra.mxu1 %v205_v54  ;;  %v408_v54 = vld [vmem:[#allocation2 + $0x530] sm:$0xff]  ;;  %v425_v55 = vld [vmem:[#allocation2 + $0x5b8] sm:$0xff] }
  0x67   :  { %652 = vmatpush.msrb.mxu0 %v308_v56  ;;  %674 = vmatpush.msrb.mxu1 %v325_v57  ;;  %v375_v56 = vld [vmem:[#allocation2 + $0x428] sm:$0xff]  ;;  %v392_v57 = vld [vmem:[#allocation2 + $0x4b0] sm:$0xff] }
  0x68   :  { %698 = vmatpush.msrb.mxu2 %v340_v59  ;;  %720 = vmatpush.msrb.mxu3 %v357_v60  ;;  %v197_v59 = vld [vmem:[%s1648_s0 + $0x64] sm:$0xff] }
  0x69   :  { %653 = vmatpush.msrb.mxu0 %v307_v61  ;;  %675 = vmatpush.msrb.mxu1 %v324_v62  ;;  %v407_v60 = vld [vmem:[#allocation2 + $0x528] sm:$0xff]  ;;  %v424_v61 = vld [vmem:[#allocation2 + $0x5b0] sm:$0xff]  ;;  %v374_v62 = vld [vmem:[#allocation2 + $0x420] sm:$0xff] }
  0x6a   :  { %699 = vmatpush.msrb.mxu2 %v339_v0  ;;  %721 = vmatpush.msrb.mxu3 %v356_v1  ;;  %v406_v0 = vld [vmem:[#allocation2 + $0x520] sm:$0xff]  ;;  %v423_v1 = vld [vmem:[#allocation2 + $0x5a8] sm:$0xff] }
  0x6b   :  { %612 = vmatmul.f32.gmra.mxu2 %v225_v2  ;;  %654 = vmatpush.msrb.mxu0 %v306_v3  ;;  %v227_v2 = vunpack.c.l.bf16 %v196_v58  ;;  %v229_v3 = vunpack.c.l.bf16 %v197_v59 }
  0x6c   :  { %676 = vmatpush.msrb.mxu1 %v323_v4  ;;  %700 = vmatpush.msrb.mxu2 %v338_v5  ;;  %v373_v4 = vld [vmem:[#allocation2 + $0x418] sm:$0xff]  ;;  %v390_v5 = vld [vmem:[#allocation2 + $0x4a0] sm:$0xff] }
  0x6d   :  { %722 = vmatpush.msrb.mxu3 %v355_v7  ;;  %566 = vmatmul.f32.gmra.mxu0 %v223_v6  ;;  %v405_v6 = vld [vmem:[#allocation2 + $0x518] sm:$0xff]  ;;  %v422_v7 = vld [vmem:[#allocation2 + $0x5a0] sm:$0xff] }
  0x6e   :  { %635 = vmatmul.f32.gmra.mxu3 %v226_v8  ;;  %731 = vmatpush.msra.mxu0 %v385_v9  ;;  %v228_v8 = vunpack.c.h.bf16 %v196_v58  ;;  %v230_v9 = vunpack.c.h.bf16 %v197_v59  ;;  %v443_v58 = vld [vmem:[#allocation2 + $0x648] sm:$0xff]  ;;  %v460_v59 = vld [vmem:[#allocation2 + $0x6d0] sm:$0xff] }
  0x6f   :  { %777 = vmatpush.msra.mxu2 %v417_v10  ;;  %677 = vmatpush.msrb.mxu1 %v322_v11  ;;  %v372_v10 = vld [vmem:[#allocation2 + $0x410] sm:$0xff]  ;;  %v389_v11 = vld [vmem:[#allocation2 + $0x498] sm:$0xff] }
  0x70   :  { %723 = vmatpush.msrb.mxu3 %v354_v13  ;;  %589 = vmatmul.f32.gmra.mxu1 %v224_v12  ;;  %v404_v12 = vld [vmem:[#allocation2 + $0x510] sm:$0xff]  ;;  %v421_v13 = vld [vmem:[#allocation2 + $0x598] sm:$0xff] }
  0x71   :  { %732 = vmatpush.msra.mxu0 %v384_v14  ;;  %754 = vmatpush.msra.mxu1 %v401_v15  ;;  %v371_v14 = vld [vmem:[#allocation2 + $0x408] sm:$0xff]  ;;  %v388_v15 = vld [vmem:[#allocation2 + $0x490] sm:$0xff] }
  0x72   :  { %778 = vmatpush.msra.mxu2 %v416_v17  ;;  %800 = vmatpush.msra.mxu3 %v433_v18  ;;  %v189_v17 = vld [vmem:[%s1648_s0 + $0x28] sm:$0xff] }
  0x73   :  { %733 = vmatpush.msra.mxu0 %v383_v19  ;;  %755 = vmatpush.msra.mxu1 %v400_v20  ;;  %v403_v18 = vld [vmem:[#allocation2 + $0x508] sm:$0xff]  ;;  %v420_v19 = vld [vmem:[#allocation2 + $0x590] sm:$0xff]  ;;  %v370_v20 = vld [vmem:[#allocation2 + $0x400] sm:$0xff] }
  0x74   :  { %779 = vmatpush.msra.mxu2 %v415_v22  ;;  %801 = vmatpush.msra.mxu3 %v432_v23  ;;  %v402_v22 = vld [vmem:[#allocation2 + $0x500] sm:$0xff]  ;;  %v419_v23 = vld [vmem:[#allocation2 + $0x588] sm:$0xff] }
  0x75   :  { %701 = vmatmul.f32.vlgmr.msrb.gmra.mxu2 %v210_v24  ;;  %734 = vmatpush.msra.mxu0 %v382_v25  ;;  %v212_v24 = vunpack.c.l.bf16 %v188_v16  ;;  %v214_v25 = vunpack.c.l.bf16 %v189_v17 }
  0x76   :  { %756 = vmatpush.msra.mxu1 %v399_v26  ;;  %780 = vmatpush.msra.mxu2 %v414_v27  ;;  %v449_v26 = vld [vmem:[#allocation2 + $0x678] sm:$0xff] }
  0x77   :  { %802 = vmatpush.msra.mxu3 %v431_v29  ;;  %655 = vmatmul.f32.vlgmr.msrb.gmra.mxu0 %v208_v28  ;;  %v481_v27 = vld [vmem:[#allocation2 + $0x778] sm:$0xff]  ;;  %v386_v28 = vld [vmem:[#allocation2 + $0x480] sm:$0xff] }
  0x78   :  { %724 = vmatmul.f32.vlgmr.msrb.gmra.mxu3 %v211_v30  ;;  %735 = vmatpush.msra.mxu0 %v381_v31  ;;  %v418_v29 = vld [vmem:[#allocation2 + $0x580] sm:$0xff]  ;;  %v213_v30 = vunpack.c.h.bf16 %v188_v16  ;;  %v215_v31 = vunpack.c.h.bf16 %v189_v17  ;;  %v487_v17 = vld [vmem:[#allocation2 + $0x7a8] sm:$0xff] }
  0x79   :  { %757 = vmatpush.msra.mxu1 %v398_v32  ;;  %781 = vmatpush.msra.mxu2 %v413_v33  ;;  %v448_v32 = vld [vmem:[#allocation2 + $0x670] sm:$0xff]  ;;  %v465_v33 = vld [vmem:[#allocation2 + $0x6f8] sm:$0xff]  ;;  %v470_v16 = vld [vmem:[#allocation2 + $0x720] sm:$0xff] }
  0x7a   :  { %803 = vmatpush.msra.mxu3 %v430_v35  ;;  %678 = vmatmul.f32.vlgmr.msrb.gmra.mxu1 %v209_v34  ;;  %v480_v34 = vld [vmem:[#allocation2 + $0x770] sm:$0xff]  ;;  %v497_v35 = vld [vmem:[#allocation2 + $0x7f8] sm:$0xff] }
  0x7b   :  { %736 = vmatpush.msra.mxu0 %v380_v36  ;;  %758 = vmatpush.msra.mxu1 %v397_v37  ;;  %v447_v36 = vld [vmem:[#allocation2 + $0x668] sm:$0xff]  ;;  %v464_v37 = vld [vmem:[#allocation2 + $0x6f0] sm:$0xff] }
  0x7c   :  { %782 = vmatpush.msra.mxu2 %v412_v38  ;;  %804 = vmatpush.msra.mxu3 %v429_v39  ;;  %v198_v38 = vld [vmem:[%s1648_s0 + $0x6c] sm:$0xff]  ;;  %v199_v39 = vld [vmem:[%s1648_s0 + $0x74] sm:$0xff] }
  0x7d   :  { %737 = vmatpush.msra.mxu0 %v379_v40  ;;  %759 = vmatpush.msra.mxu1 %v396_v41  ;;  %v479_v40 = vld [vmem:[#allocation2 + $0x768] sm:$0xff]  ;;  %v496_v41 = vld [vmem:[#allocation2 + $0x7f0] sm:$0xff] }
  0x7e   :  { %783 = vmatpush.msra.mxu2 %v411_v42  ;;  %805 = vmatpush.msra.mxu3 %v428_v43  ;;  %v446_v42 = vld [vmem:[#allocation2 + $0x660] sm:$0xff]  ;;  %v463_v43 = vld [vmem:[#allocation2 + $0x6e8] sm:$0xff] }
  0x7f   :  { %738 = vmatpush.msra.mxu0 %v378_v44  ;;  %760 = vmatpush.msra.mxu1 %v395_v45  ;;  %v478_v44 = vld [vmem:[#allocation2 + $0x760] sm:$0xff]  ;;  %v495_v45 = vld [vmem:[#allocation2 + $0x7e8] sm:$0xff] }
  0x80   :  { %784 = vmatpush.msra.mxu2 %v410_v46  ;;  %806 = vmatpush.msra.mxu3 %v427_v47  ;;  %v231_v46 = vunpack.c.l.bf16 %v198_v38  ;;  %v233_v47 = vunpack.c.l.bf16 %v199_v39 }
  0x81   :  { %739 = vmatpush.msra.mxu0 %v377_v48  ;;  %761 = vmatpush.msra.mxu1 %v394_v49  ;;  %v445_v48 = vld [vmem:[#allocation2 + $0x658] sm:$0xff]  ;;  %v462_v49 = vld [vmem:[#allocation2 + $0x6e0] sm:$0xff] }
  0x82   :  { %785 = vmatpush.msra.mxu2 %v409_v50  ;;  %807 = vmatpush.msra.mxu3 %v426_v51  ;;  %v477_v50 = vld [vmem:[#allocation2 + $0x758] sm:$0xff]  ;;  %v494_v51 = vld [vmem:[#allocation2 + $0x7e0] sm:$0xff] }
  0x83   :  { %740 = vmatpush.msra.mxu0 %v376_v52  ;;  %762 = vmatpush.msra.mxu1 %v393_v53  ;;  %v232_v52 = vunpack.c.h.bf16 %v198_v38  ;;  %v234_v53 = vunpack.c.h.bf16 %v199_v39  ;;  %v513_v38 = vld [vmem:[#allocation2 + $0x878] sm:$0xff]  ;;  %v450_v39 = vld [vmem:[#allocation2 + $0x680] sm:$0xff] }
  0x84   :  { %786 = vmatpush.msra.mxu2 %v408_v54  ;;  %808 = vmatpush.msra.mxu3 %v425_v55  ;;  %v444_v54 = vld [vmem:[#allocation2 + $0x650] sm:$0xff]  ;;  %v461_v55 = vld [vmem:[#allocation2 + $0x6d8] sm:$0xff] }
  0x85   :  { %741 = vmatpush.msra.mxu0 %v375_v56  ;;  %763 = vmatpush.msra.mxu1 %v392_v57  ;;  %v476_v56 = vld [vmem:[#allocation2 + $0x750] sm:$0xff]  ;;  %v493_v57 = vld [vmem:[#allocation2 + $0x7d8] sm:$0xff] }
  0x86   :  { %787 = vmatpush.msra.mxu2 %v407_v60  ;;  %809 = vmatpush.msra.mxu3 %v424_v61  ;;  %v475_v60 = vld [vmem:[#allocation2 + $0x748] sm:$0xff]  ;;  %v492_v61 = vld [vmem:[#allocation2 + $0x7d0] sm:$0xff] }
  0x87   :  { %742 = vmatpush.msra.mxu0 %v374_v62  ;;  %764 = vmatpush.msra.mxu1 %v391_v63  ;;  %v442_v62 = vld [vmem:[#allocation2 + $0x640] sm:$0xff]  ;;  %v459_v63 = vld [vmem:[#allocation2 + $0x6c8] sm:$0xff] }
  0x88   :  { %788 = vmatpush.msra.mxu2 %v406_v0  ;;  %810 = vmatpush.msra.mxu3 %v423_v1  ;;  %v474_v0 = vld [vmem:[#allocation2 + $0x740] sm:$0xff]  ;;  %v491_v1 = vld [vmem:[#allocation2 + $0x7c8] sm:$0xff] }
  0x89   :  { %658 = vmatmul.f32.gmra.mxu0 %v227_v2  ;;  %704 = vmatmul.f32.gmra.mxu2 %v229_v3  ;;  %v441_v2 = vld [vmem:[#allocation2 + $0x638] sm:$0xff]  ;;  %v458_v3 = vld [vmem:[#allocation2 + $0x6c0] sm:$0xff] }
  0x8a   :  { %743 = vmatpush.msra.mxu0 %v373_v4  ;;  %765 = vmatpush.msra.mxu1 %v390_v5  ;;  %v473_v4 = vld [vmem:[#allocation2 + $0x738] sm:$0xff]  ;;  %v490_v5 = vld [vmem:[#allocation2 + $0x7c0] sm:$0xff] }
  0x8b   :  { %789 = vmatpush.msra.mxu2 %v405_v6  ;;  %811 = vmatpush.msra.mxu3 %v422_v7  ;;  %v440_v6 = vld [vmem:[#allocation2 + $0x630] sm:$0xff]  ;;  %v457_v7 = vld [vmem:[#allocation2 + $0x6b8] sm:$0xff] }
  0x8c   :  { %681 = vmatmul.f32.gmra.mxu1 %v228_v8  ;;  %727 = vmatmul.f32.gmra.mxu3 %v230_v9  ;;  %v472_v8 = vld [vmem:[#allocation2 + $0x730] sm:$0xff]  ;;  %v489_v9 = vld [vmem:[#allocation2 + $0x7b8] sm:$0xff] }
  0x8d   :  { %744 = vmatpush.msra.mxu0 %v372_v10  ;;  %766 = vmatpush.msra.mxu1 %v389_v11  ;;  %v439_v10 = vld [vmem:[#allocation2 + $0x628] sm:$0xff]  ;;  %v456_v11 = vld [vmem:[#allocation2 + $0x6b0] sm:$0xff] }
  0x8e   :  { %790 = vmatpush.msra.mxu2 %v404_v12  ;;  %812 = vmatpush.msra.mxu3 %v421_v13  ;;  %v471_v12 = vld [vmem:[#allocation2 + $0x728] sm:$0xff]  ;;  %v488_v13 = vld [vmem:[#allocation2 + $0x7b0] sm:$0xff] }
  0x8f   :  { %745 = vmatpush.msra.mxu0 %v371_v14  ;;  %767 = vmatpush.msra.mxu1 %v388_v15  ;;  %v438_v14 = vld [vmem:[#allocation2 + $0x620] sm:$0xff]  ;;  %v455_v15 = vld [vmem:[#allocation2 + $0x6a8] sm:$0xff] }
  0x90   :  { %791 = vmatpush.msra.mxu2 %v403_v18  ;;  %813 = vmatpush.msra.mxu3 %v420_v19  ;;  %v437_v18 = vld [vmem:[#allocation2 + $0x618] sm:$0xff]  ;;  %v454_v19 = vld [vmem:[#allocation2 + $0x6a0] sm:$0xff] }
  0x91   :  { %746 = vmatpush.msra.mxu0 %v370_v20  ;;  %768 = vmatpush.msra.mxu1 %v387_v21  ;;  %v469_v20 = vld [vmem:[#allocation2 + $0x718] sm:$0xff]  ;;  %v486_v21 = vld [vmem:[#allocation2 + $0x7a0] sm:$0xff] }
  0x92   :  { %792 = vmatpush.msra.mxu2 %v402_v22  ;;  %814 = vmatpush.msra.mxu3 %v419_v23  ;;  %v436_v22 = vld [vmem:[#allocation2 + $0x610] sm:$0xff]  ;;  %v453_v23 = vld [vmem:[#allocation2 + $0x698] sm:$0xff] }
  0x93   :  { %747 = vmatmul.f32.vlgmr.msra.gmra.mxu0 %v212_v24  ;;  %793 = vmatmul.f32.vlgmr.msra.gmra.mxu2 %v214_v25  ;;  %v468_v24 = vld [vmem:[#allocation2 + $0x710] sm:$0xff]  ;;  %v485_v25 = vld [vmem:[#allocation2 + $0x798] sm:$0xff] }
  0x94   :  { %823 = vmatpush.msrb.mxu0 %v449_v26  ;;  %869 = vmatpush.msrb.mxu2 %v481_v27  ;;  %v435_v26 = vld [vmem:[#allocation2 + $0x608] sm:$0xff]  ;;  %v452_v27 = vld [vmem:[#allocation2 + $0x690] sm:$0xff] }
  0x95   :  { %769 = vmatpush.msra.mxu1 %v386_v28  ;;  %815 = vmatpush.msra.mxu3 %v418_v29  ;;  %v190_v28 = vld [vmem:[%s1648_s0 + $0x30] sm:$0xff]  ;;  %v191_v29 = vld [vmem:[%s1648_s0 + $0x38] sm:$0xff] }
  0x96   :  { %770 = vmatmul.f32.vlgmr.msra.gmra.mxu1 %v213_v30  ;;  %816 = vmatmul.f32.vlgmr.msra.gmra.mxu3 %v215_v31  ;;  %v467_v30 = vld [vmem:[#allocation2 + $0x708] sm:$0xff]  ;;  %v484_v31 = vld [vmem:[#allocation2 + $0x790] sm:$0xff] }
  0x97   :  { %824 = vmatpush.msrb.mxu0 %v448_v32  ;;  %846 = vmatpush.msrb.mxu1 %v465_v33  ;;  %v434_v32 = vld [vmem:[#allocation2 + $0x600] sm:$0xff]  ;;  %v451_v33 = vld [vmem:[#allocation2 + $0x688] sm:$0xff] }
  0x98   :  { %870 = vmatpush.msrb.mxu2 %v480_v34  ;;  %892 = vmatpush.msrb.mxu3 %v497_v35  ;;  %v466_v34 = vld [vmem:[#allocation2 + $0x700] sm:$0xff]  ;;  %v483_v35 = vld [vmem:[#allocation2 + $0x788] sm:$0xff] }
  0x99   :  { %825 = vmatpush.msrb.mxu0 %v447_v36  ;;  %847 = vmatpush.msrb.mxu1 %v464_v37  ;;  %v216_v36 = vunpack.c.l.bf16 %v190_v28  ;;  %v218_v37 = vunpack.c.l.bf16 %v191_v29 }
  0x9a   :  { %871 = vmatpush.msrb.mxu2 %v479_v40  ;;  %893 = vmatpush.msrb.mxu3 %v496_v41  ;;  %v217_v40 = vunpack.c.h.bf16 %v190_v28  ;;  %v482_v41 = vld [vmem:[#allocation2 + $0x780] sm:$0xff] }
  0x9b   :  { %826 = vmatpush.msrb.mxu0 %v446_v42  ;;  %848 = vmatpush.msrb.mxu1 %v463_v43  ;;  %v219_v42 = vunpack.c.h.bf16 %v191_v29  ;;  %v512_v43 = vld [vmem:[#allocation2 + $0x870] sm:$0xff] }
  0x9c   :  { %872 = vmatpush.msrb.mxu2 %v478_v44  ;;  %894 = vmatpush.msrb.mxu3 %v495_v45  ;;  %v529_v44 = vld [vmem:[#allocation2 + $0x8f8] sm:$0xff]  ;;  %v202_v29 = vld [vmem:[%s1648_s0 + $0x8c] sm:$0xff] }
  0x9d   :  { %750 = vmatmul.f32.gmra.mxu0 %v231_v46  ;;  %796 = vmatmul.f32.gmra.mxu2 %v233_v47  ;;  %v200_v45 = vld [vmem:[%s1648_s0 + $0x7c] sm:$0xff]  ;;  %v535_v46 = vld [vmem:[#allocation2 + $0x928] sm:$0xff] }
  0x9e   :  { %827 = vmatpush.msrb.mxu0 %v445_v48  ;;  %849 = vmatpush.msrb.mxu1 %v462_v49  ;;  %v511_v47 = vld [vmem:[#allocation2 + $0x868] sm:$0xff]  ;;  %v528_v49 = vld [vmem:[#allocation2 + $0x8f0] sm:$0xff] }
  0x9f   :  { %873 = vmatpush.msrb.mxu2 %v477_v50  ;;  %895 = vmatpush.msrb.mxu3 %v494_v51  ;;  %v201_v48 = vld [vmem:[%s1648_s0 + $0x84] sm:$0xff] }
  0xa0   :  { %773 = vmatmul.f32.gmra.mxu1 %v232_v52  ;;  %819 = vmatmul.f32.gmra.mxu3 %v234_v53  ;;  %v534_v50 = vld [vmem:[#allocation2 + $0x920] sm:$0xff]  ;;  %v235_v52 = vunpack.c.l.bf16 %v200_v45  ;;  %v527_v53 = vld [vmem:[#allocation2 + $0x8e8] sm:$0xff] }
  0xa1   :  { %828 = vmatpush.msrb.mxu0 %v444_v54  ;;  %850 = vmatpush.msrb.mxu1 %v461_v55  ;;  %v510_v51 = vld [vmem:[#allocation2 + $0x860] sm:$0xff]  ;;  %v237_v54 = vunpack.c.l.bf16 %v201_v48  ;;  %v509_v55 = vld [vmem:[#allocation2 + $0x858] sm:$0xff] }
  0xa2   :  { %874 = vmatpush.msrb.mxu2 %v476_v56  ;;  %896 = vmatpush.msrb.mxu3 %v493_v57  ;;  %v526_v56 = vld [vmem:[#allocation2 + $0x8e0] sm:$0xff]  ;;  %v236_v57 = vunpack.c.h.bf16 %v200_v45 }
  0xa3   :  { %829 = vmatpush.msrb.mxu0 %v443_v58  ;;  %851 = vmatpush.msrb.mxu1 %v460_v59  ;;  %v238_v58 = vunpack.c.h.bf16 %v201_v48  ;;  %v533_v59 = vld [vmem:[#allocation2 + $0x918] sm:$0xff] }
  0xa4   :  { %875 = vmatpush.msrb.mxu2 %v475_v60  ;;  %897 = vmatpush.msrb.mxu3 %v492_v61  ;;  %v508_v60 = vld [vmem:[#allocation2 + $0x850] sm:$0xff]  ;;  %v525_v61 = vld [vmem:[#allocation2 + $0x8d8] sm:$0xff] }
  0xa5   :  { %830 = vmatpush.msrb.mxu0 %v442_v62  ;;  %852 = vmatpush.msrb.mxu1 %v459_v63  ;;  %v532_v62 = vld [vmem:[#allocation2 + $0x910] sm:$0xff]  ;;  %v507_v63 = vld [vmem:[#allocation2 + $0x848] sm:$0xff]  ;;  %v999_v45 = vld [vmem:[#allocation6 + $0x68] sm:$0xff] }
  0xa6   :  { %876 = vmatpush.msrb.mxu2 %v474_v0  ;;  %898 = vmatpush.msrb.mxu3 %v491_v1  ;;  %v524_v0 = vld [vmem:[#allocation2 + $0x8d0] sm:$0xff]  ;;  %v531_v1 = vld [vmem:[#allocation2 + $0x908] sm:$0xff] }
  0xa7   :  { %831 = vmatpush.msrb.mxu0 %v441_v2  ;;  %853 = vmatpush.msrb.mxu1 %v458_v3  ;;  %v193_v2 = vld [vmem:[%s1648_s0 + $0x48] sm:$0xf]  ;;  %v506_v3 = vld [vmem:[#allocation2 + $0x840] sm:$0xff] }
  0xa8   :  { %877 = vmatpush.msrb.mxu2 %v473_v4  ;;  %899 = vmatpush.msrb.mxu3 %v490_v5  ;;  %v523_v4 = vld [vmem:[#allocation2 + $0x8c8] sm:$0xff]  ;;  %v530_v5 = vld [vmem:[#allocation2 + $0x900] sm:$0xff] }
  0xa9   :  { %832 = vmatpush.msrb.mxu0 %v440_v6  ;;  %854 = vmatpush.msrb.mxu1 %v457_v7  ;;  %v505_v6 = vld [vmem:[#allocation2 + $0x838] sm:$0xff]  ;;  %v522_v7 = vld [vmem:[#allocation2 + $0x8c0] sm:$0xff] }
  0xaa   :  { %878 = vmatpush.msrb.mxu2 %v472_v8  ;;  %900 = vmatpush.msrb.mxu3 %v489_v9  ;;  %v222_v8 = vunpack.c.l.bf16 %v193_v2  ;;  %v504_v9 = vld [vmem:[#allocation2 + $0x830] sm:$0xff]  ;;  %v991_v2 = vld [vmem:[#allocation6 + $0x28] sm:$0xff] }
  0xab   :  { %833 = vmatpush.msrb.mxu0 %v439_v10  ;;  %855 = vmatpush.msrb.mxu1 %v456_v11  ;;  %v521_v10 = vld [vmem:[#allocation2 + $0x8b8] sm:$0xff]  ;;  %v503_v11 = vld [vmem:[#allocation2 + $0x828] sm:$0xff] }
  0xac   :  { %879 = vmatpush.msrb.mxu2 %v471_v12  ;;  %901 = vmatpush.msrb.mxu3 %v488_v13  ;;  %v520_v12 = vld [vmem:[#allocation2 + $0x8b0] sm:$0xff] }
  0xad   :  { %834 = vmatpush.msrb.mxu0 %v438_v14  ;;  %856 = vmatpush.msrb.mxu1 %v455_v15  ;;  %v203_v13 = vld [vmem:[%s1648_s0 + $0x94] sm:$0xf]  ;;  %v502_v14 = vld [vmem:[#allocation2 + $0x820] sm:$0xff]  ;;  %v519_v15 = vld [vmem:[#allocation2 + $0x8a8] sm:$0xff] }
  0xae   :  { %880 = vmatpush.msrb.mxu2 %v470_v16  ;;  %902 = vmatpush.msrb.mxu3 %v487_v17  ;;  %v501_v16 = vld [vmem:[#allocation2 + $0x818] sm:$0xff]  ;;  %v518_v17 = vld [vmem:[#allocation2 + $0x8a0] sm:$0xff] }
  0xaf   :  { %835 = vmatpush.msrb.mxu0 %v437_v18  ;;  %857 = vmatpush.msrb.mxu1 %v454_v19  ;;  %v241_v18 = vunpack.c.l.bf16 %v203_v13  ;;  %v500_v19 = vld [vmem:[#allocation2 + $0x810] sm:$0xff]  ;;  %v988_v13 = vld [vmem:[#allocation6 + $0x10] sm:$0xff] }
  0xb0   :  { %881 = vmatpush.msrb.mxu2 %v469_v20  ;;  %903 = vmatpush.msrb.mxu3 %v486_v21  ;;  %v517_v20 = vld [vmem:[#allocation2 + $0x898] sm:$0xff]  ;;  %v192_v21 = vld [vmem:[%s1648_s0 + $0x40] sm:$0xff] }
  0xb1   :  { %836 = vmatpush.msrb.mxu0 %v436_v22  ;;  %858 = vmatpush.msrb.mxu1 %v453_v23  ;;  %v499_v22 = vld [vmem:[#allocation2 + $0x808] sm:$0xff]  ;;  %v516_v23 = vld [vmem:[#allocation2 + $0x890] sm:$0xff]  ;;  %v221_v28 = vunpack.c.h.bf16 %v192_v21 }
  0xb2   :  { %882 = vmatpush.msrb.mxu2 %v468_v24  ;;  %904 = vmatpush.msrb.mxu3 %v485_v25  ;;  %v498_v24 = vld [vmem:[#allocation2 + $0x800] sm:$0xff]  ;;  %v515_v25 = vld [vmem:[#allocation2 + $0x888] sm:$0xff] }
  0xb3   :  { %837 = vmatpush.msrb.mxu0 %v435_v26  ;;  %859 = vmatpush.msrb.mxu1 %v452_v27  ;;  %v220_v26 = vunpack.c.l.bf16 %v192_v21  ;;  %v514_v27 = vld [vmem:[#allocation2 + $0x880] sm:$0xff] }
  0xb4   :  { %883 = vmatpush.msrb.mxu2 %v467_v30  ;;  %905 = vmatpush.msrb.mxu3 %v484_v31  ;;  %v239_v30 = vunpack.c.l.bf16 %v202_v29  ;;  %v240_v31 = vunpack.c.h.bf16 %v202_v29 }
  0xb5   :  { %838 = vmatpush.msrb.mxu0 %v434_v32  ;;  %860 = vmatpush.msrb.mxu1 %v451_v33 }
  0xb6   :  { %884 = vmatpush.msrb.mxu2 %v466_v34  ;;  %906 = vmatpush.msrb.mxu3 %v483_v35 }
  0xb7   :  { %839 = vmatmul.f32.vlgmr.msrb.gmra.mxu0 %v216_v36  ;;  %885 = vmatmul.f32.vlgmr.msrb.gmra.mxu2 %v218_v37 }
  0xb8   :  { %915 = vmatpush.msra.mxu0 %v513_v38  ;;  %861 = vmatpush.msrb.mxu1 %v450_v39  ;;  %v1206_v39 = vld [vmem:[#allocation4] ss:$0 sm:$0xff] }
  0xb9   :  { %907 = vmatpush.msrb.mxu3 %v482_v41  ;;  %862 = vmatmul.f32.vlgmr.msrb.gmra.mxu1 %v217_v40  ;;  %v1001_v40 = vld [vmem:[#allocation6 + $0x78] sm:$0xff] }
  0xba   :  { %908 = vmatmul.f32.vlgmr.msrb.gmra.mxu3 %v219_v42  ;;  %916 = vmatpush.msra.mxu0 %v512_v43 }
  0xbb   :  { %938 = vmatpush.msra.mxu1 %v529_v44  ;;  %971 = vmatpush.msra.mxu2 %v535_v46  ;;  %v1000_v44 = vld [vmem:[#allocation6 + $0x70] sm:$0xff] }
  0xbc   :  { %917 = vmatpush.msra.mxu0 %v511_v47  ;;  %1006 = vmatpush.msra.mxu3 %v1001_v40  ;;  %v1042_v40 = vld [vmem:[#allocation9 + $0x58] sm:$0xff] }
  0xbd   :  { %939 = vmatpush.msra.mxu1 %v528_v49  ;;  %972 = vmatpush.msra.mxu2 %v534_v50  ;;  %v998_v49 = vld [vmem:[#allocation6 + $0x60] sm:$0xff] }
  0xbe   :  { %918 = vmatpush.msra.mxu0 %v510_v51  ;;  %1007 = vmatpush.msra.mxu3 %v1000_v44  ;;  %v997_v51 = vld [vmem:[#allocation6 + $0x58] sm:$0xff] }
  0xbf   :  { %940 = vmatpush.msra.mxu1 %v527_v53  ;;  %842 = vmatmul.f32.gmra.mxu0 %v235_v52  ;;  %v996_v52 = vld [vmem:[#allocation6 + $0x50] sm:$0xff] }
  0xc0   :  { %888 = vmatmul.f32.gmra.mxu2 %v237_v54  ;;  %919 = vmatpush.msra.mxu0 %v509_v55  ;;  %v1041_v44 = vld [vmem:[#allocation9 + $0x50] sm:$0xff] }
  0xc1   :  { %941 = vmatpush.msra.mxu1 %v526_v56  ;;  %973 = vmatpush.msra.mxu2 %v533_v59  ;;  %v995_v56 = vld [vmem:[#allocation6 + $0x48] sm:$0xff]  ;;  %v994_v59 = vld [vmem:[#allocation6 + $0x40] sm:$0xff] }
  0xc2   :  { %865 = vmatmul.f32.gmra.mxu1 %v236_v57  ;;  %911 = vmatmul.f32.gmra.mxu3 %v238_v58 }
  0xc3   :  { %920 = vmatpush.msra.mxu0 %v508_v60  ;;  %942 = vmatpush.msra.mxu1 %v525_v61 }
  0xc4   :  { %974 = vmatpush.msra.mxu2 %v532_v62  ;;  %1008 = vmatpush.msra.mxu3 %v999_v45  ;;  %v993_v62 = vld [vmem:[#allocation6 + $0x38] sm:$0xff] }
  0xc5   :  { %921 = vmatpush.msra.mxu0 %v507_v63  ;;  %943 = vmatpush.msra.mxu1 %v524_v0  ;;  %v992_v0 = vld [vmem:[#allocation6 + $0x30] sm:$0xff] }
  0xc6   :  { %975 = vmatpush.msra.mxu2 %v531_v1  ;;  %1009 = vmatpush.msra.mxu3 %v998_v49  ;;  %v1040_v49 = vld [vmem:[#allocation9 + $0x48] sm:$0xff] }
  0xc7   :  { %922 = vmatpush.msra.mxu0 %v506_v3  ;;  %944 = vmatpush.msra.mxu1 %v523_v4 }
  0xc8   :  { %976 = vmatpush.msra.mxu2 %v530_v5  ;;  %1010 = vmatpush.msra.mxu3 %v997_v51  ;;  %v1039_v51 = vld [vmem:[#allocation9 + $0x40] sm:$0xff] }
  0xc9   :  { %923 = vmatpush.msra.mxu0 %v505_v6  ;;  %945 = vmatpush.msra.mxu1 %v522_v7 }
  0xca   :  { %1176 = vmatmul.msk.f32.vlgmr.msra.gmra.mxu2 %vm540_vm0, %v222_v8  ;;  %1011 = vmatpush.msra.mxu3 %v996_v52 }
  0xcb   :  { %924 = vmatpush.msra.mxu0 %v504_v9  ;;  %946 = vmatpush.msra.mxu1 %v521_v10  ;;  %v990_v9 = vld [vmem:[#allocation6 + $0x20] sm:$0xff] }
  0xcc   :  { %1012 = vmatpush.msra.mxu3 %v995_v56 }
  0xcd   :  { %925 = vmatpush.msra.mxu0 %v503_v11  ;;  %947 = vmatpush.msra.mxu1 %v520_v12  ;;  %v989_v11 = vld [vmem:[#allocation6 + $0x18] sm:$0xff] }
  0xce   :  { %1013 = vmatpush.msra.mxu3 %v994_v59 }
  0xcf   :  { %926 = vmatpush.msra.mxu0 %v502_v14  ;;  %948 = vmatpush.msra.mxu1 %v519_v15  ;;  %v987_v15 = vld [vmem:[#allocation6 + $0x8] sm:$0xff] }
  0xd0   :  { %1014 = vmatpush.msra.mxu3 %v993_v62  ;;  %v1036_v62 = vld [vmem:[#allocation9 + $0x28] sm:$0xff] }
  0xd1   :  { %927 = vmatpush.msra.mxu0 %v501_v16  ;;  %949 = vmatpush.msra.mxu1 %v518_v17 }
  0xd2   :  { %1177 = vmatmul.msk.f32.gmra.mxu2 %vm540_vm0, %v241_v18  ;;  %1015 = vmatpush.msra.mxu3 %v992_v0 }
  0xd3   :  { %928 = vmatpush.msra.mxu0 %v500_v19  ;;  %950 = vmatpush.msra.mxu1 %v517_v20  ;;  %v986_v19 = vld [vmem:[#allocation6] sm:$0xff] }
  0xd4   :  { %1016 = vmatpush.msra.mxu3 %v991_v2 }
  0xd5   :  { %929 = vmatpush.msra.mxu0 %v499_v22  ;;  %951 = vmatpush.msra.mxu1 %v516_v23 }
  0xd6   :  { %1017 = vmatpush.msra.mxu3 %v990_v9 }
  0xd7   :  { %930 = vmatpush.msra.mxu0 %v498_v24  ;;  %952 = vmatpush.msra.mxu1 %v515_v25 }
  0xd8   :  { %931 = vmatmul.f32.vlgmr.msra.gmra.mxu0 %v220_v26  ;;  %1018 = vmatpush.msra.mxu3 %v989_v11 }
  0xd9   :  { %953 = vmatpush.msra.mxu1 %v514_v27 }
  0xda   :  { %954 = vmatmul.f32.vlgmr.msra.gmra.mxu1 %v221_v28  ;;  %1019 = vmatpush.msra.mxu3 %v988_v13  ;;  %v1032_v13 = vld [vmem:[#allocation9 + $0x8] sm:$0xff] }
  0xdc   :  { %1020 = vmatpush.msra.mxu3 %v987_v15  ;;  %v1091_v15 = vld [vmem:[#allocation12 + $0x78] sm:$0xff] }
  0xdd   :  { %1096 = vmatpush.msrb.mxu0 %v1091_v15 }
  0xde   :  { %1021 = vmatpush.msra.mxu3 %v986_v19  ;;  %v1087_v19 = vld [vmem:[#allocation12 + $0x58] sm:$0xff] }
  0xe0   :  { %934 = vmatmul.f32.gmra.mxu0 %v239_v30  ;;  %v564_v32 = vpop.f32.mrf.mxu0  ;;  %1178 = vmatpush.msrb.mxu3 %v1091_v15 }
  0xe1   :  { %v565_v43 = vadd.f32 %v1206_v39, %v564_v32  ;;  %v1045_v32 = vld [vmem:[#allocation9 + $0x70] sm:$0xff] }
  0xe2   :  { %957 = vmatmul.f32.gmra.mxu1 %v240_v31  ;;  %v1046_v31 = vld [vmem:[#allocation9 + $0x78] sm:$0xff] }
  0xe3   :  { %v587_v34 = vpop.f32.mrf.mxu1  ;;  %1051 = vmatpush.msrb.mxu2 %v1046_v31  ;;  %v1079_v31 = vld [vmem:[#allocation12 + $0x18] sm:$0xff] }
  0xe4   :  { %v610_v33 = vpop.f32.mrf.mxu2  ;;  %v588_v48 = vadd.f32 %v587_v34, %v565_v43 }
  0xe5   :  { %1052 = vmatpush.msrb.mxu2 %v1045_v32 }
  0xe6   :  { %v611_v55 = vadd.f32 %v610_v33, %v588_v48 }
  0xe7   :  { %v633_v37 = vpop.f32.mrf.mxu3 }
  0xe8   :  { %v634_v61 = vadd.f32 %v633_v37, %v611_v55 }
  0xea   :  { %v567_v35 = vpop.f32.mrf.mxu0 }
  0xeb   :  { %v568_v50 = vadd.f32 %v1206_v39, %v567_v35  ;;  %v1044_v35 = vld [vmem:[#allocation9 + $0x68] sm:$0xff] }
  0xec   :  { %1053 = vmatpush.msrb.mxu2 %v1044_v35  ;;  %v1078_v35 = vld [vmem:[#allocation12 + $0x10] sm:$0xff] }
  0xed   :  { %v590_v38 = vpop.f32.mrf.mxu1 }
  0xee   :  { %v613_v36 = vpop.f32.mrf.mxu2  ;;  %v591_v58 = vadd.f32 %v590_v38, %v568_v50  ;;  %v1043_v38 = vld [vmem:[#allocation9 + $0x60] sm:$0xff] }
  0xef   :  { %1054 = vmatpush.msrb.mxu2 %v1043_v38  ;;  %v1136_v38 = vld [vmem:[#allocation15 + $0x78] sm:$0xff] }
  0xf0   :  { %v614_v63 = vadd.f32 %v613_v36, %v591_v58  ;;  %v1037_v58 = vld [vmem:[#allocation9 + $0x30] sm:$0xff]  ;;  %1141 = vmatpush.msrb.mxu1 %v1136_v38 }
  0xf1   :  { %v636_v46 = vpop.f32.mrf.mxu3  ;;  %1055 = vmatpush.msrb.mxu2 %v1042_v40  ;;  %v1134_v40 = vld [vmem:[#allocation15 + $0x68] sm:$0xff] }
  0xf2   :  { %v637_v5 = vadd.f32 %v636_v46, %v614_v63 }
  0xf3   :  { %1056 = vmatpush.msrb.mxu2 %v1041_v44  ;;  %v1130_v44 = vld [vmem:[#allocation15 + $0x48] sm:$0xff] }
  0xf4   :  { %v656_v41 = vpop.f32.mrf.mxu0 }
  0xf5   :  { %v657_v1 = vadd.f32 %v656_v41, %v634_v61  ;;  %1057 = vmatpush.msrb.mxu2 %v1040_v49  ;;  %v1126_v49 = vld [vmem:[#allocation15 + $0x28] sm:$0xff] }
  0xf7   :  { %v679_v47 = vpop.f32.mrf.mxu1  ;;  %1058 = vmatpush.msrb.mxu2 %v1039_v51 }
  0xf8   :  { %v702_v42 = vpop.f32.mrf.mxu2  ;;  %v680_v8 = vadd.f32 %v679_v47, %v657_v1  ;;  %v1035_v1 = vld [vmem:[#allocation9 + $0x20] sm:$0xff] }
  0xfa   :  { %v703_v12 = vadd.f32 %v702_v42, %v680_v8 }
  0xfb   :  { %v725_v60 = vpop.f32.mrf.mxu3 }
  0xfc   :  { %v726_v18 = vadd.f32 %v725_v60, %v703_v12  ;;  %v1033_v12 = vld [vmem:[#allocation9 + $0x10] sm:$0xff] }
 0x106   :  { %v659_v53 = vpop.f32.mrf.mxu0 }
 0x107   :  { %v660_v10 = vadd.f32 %v659_v53, %v637_v5  ;;  %v1038_v53 = vld [vmem:[#allocation9 + $0x38] sm:$0xff] }
 0x108   :  { %1059 = vmatpush.msrb.mxu2 %v1038_v53 }
 0x109   :  { %v682_v57 = vpop.f32.mrf.mxu1 }
 0x10a   :  { %v683_v14 = vadd.f32 %v682_v57, %v660_v10  ;;  %1060 = vmatpush.msrb.mxu2 %v1037_v58  ;;  %v1123_v58 = vld [vmem:[#allocation15 + $0x10] sm:$0xff] }
 0x10c   :  { %v705_v54 = vpop.f32.mrf.mxu2  ;;  %1061 = vmatpush.msrb.mxu2 %v1036_v62 }
 0x10d   :  { %v706_v22 = vadd.f32 %v705_v54, %v683_v14  ;;  %v1031_v14 = vld [vmem:[#allocation9] sm:$0xff] }
 0x10e   :  { %1062 = vmatpush.msrb.mxu2 %v1035_v1 }
 0x10f   :  { %v728_v6 = vpop.f32.mrf.mxu3 }
 0x110   :  { %v748_v3 = vpop.f32.mrf.mxu0  ;;  %v729_v24 = vadd.f32 %v728_v6, %v706_v22  ;;  %v1084_v22 = vld [vmem:[#allocation12 + $0x40] sm:$0xff] }
 0x111   :  { %v749_v23 = vadd.f32 %v748_v3, %v726_v18  ;;  %v1088_v18 = vld [vmem:[#allocation12 + $0x60] sm:$0xff] }
 0x113   :  { %v771_v7 = vpop.f32.mrf.mxu1 }
 0x114   :  { %v772_v25 = vadd.f32 %v771_v7, %v749_v23  ;;  %v1083_v23 = vld [vmem:[#allocation12 + $0x38] sm:$0xff] }
 0x116   :  { %v794_v4 = vpop.f32.mrf.mxu2 }
 0x117   :  { %v795_v28 = vadd.f32 %v794_v4, %v772_v25  ;;  %v1034_v4 = vld [vmem:[#allocation9 + $0x18] sm:$0xff] }
 0x118   :  { %1063 = vmatpush.msrb.mxu2 %v1034_v4  ;;  %v1082_v25 = vld [vmem:[#allocation12 + $0x30] sm:$0xff]  ;;  %v1210_v4 = vld [vmem:[#allocation16] ss:$0 sm:$0xff] }
 0x119   :  { %v817_v20 = vpop.f32.mrf.mxu3 }
 0x11a   :  { %v751_v16 = vpop.f32.mrf.mxu0  ;;  %v818_v34 = vadd.f32 %v817_v20, %v795_v28  ;;  %1064 = vmatpush.msrb.mxu2 %v1033_v12  ;;  %v1086_v20 = vld [vmem:[#allocation12 + $0x50] sm:$0xff] }
 0x11b   :  { %v752_v30 = vadd.f32 %v751_v16, %v729_v24  ;;  %v1090_v16 = vld [vmem:[#allocation12 + $0x70] sm:$0xff]  ;;  %v1207_v24 = vld [vmem:[#allocation7] ss:$0 sm:$0xff] }
 0x11c   :  { %1065 = vmatpush.msrb.mxu2 %v1032_v13  ;;  %1097 = vmatpush.msrb.mxu0 %v1090_v16 }
 0x11d   :  { %v774_v21 = vpop.f32.mrf.mxu1  ;;  %1179 = vmatpush.msrb.mxu3 %v1090_v16 }
 0x11e   :  { %v775_v36 = vadd.f32 %v774_v21, %v752_v30  ;;  %1066 = vmatpush.msrb.mxu2 %v1031_v14  ;;  %v1085_v21 = vld [vmem:[#allocation12 + $0x48] sm:$0xff] }
 0x120   :  { %v797_v17 = vpop.f32.mrf.mxu2 }
 0x121   :  { %v798_v39 = vadd.f32 %v797_v17, %v775_v36  ;;  %v1089_v17 = vld [vmem:[#allocation12 + $0x68] sm:$0xff] }
 0x122   :  { %1098 = vmatpush.msrb.mxu0 %v1089_v17  ;;  %1180 = vmatpush.msrb.mxu3 %v1089_v17  ;;  %v1077_v36 = vld [vmem:[#allocation12 + $0x8] sm:$0xff] }
 0x123   :  { %v820_v33 = vpop.f32.mrf.mxu3 }
 0x124   :  { %v821_v47 = vadd.f32 %v820_v33, %v798_v39  ;;  %1099 = vmatpush.msrb.mxu0 %v1088_v18  ;;  %1181 = vmatpush.msrb.mxu3 %v1088_v18  ;;  %v1135_v39 = vld [vmem:[#allocation15 + $0x70] sm:$0xff] }
 0x125   :  { %1142 = vmatpush.msrb.mxu1 %v1135_v39 }
 0x126   :  { %1100 = vmatpush.msrb.mxu0 %v1087_v19  ;;  %1182 = vmatpush.msrb.mxu3 %v1087_v19 }
 0x127   :  { %1143 = vmatpush.msrb.mxu1 %v1134_v40 }
 0x128   :  { %1101 = vmatpush.msrb.mxu0 %v1086_v20  ;;  %1183 = vmatpush.msrb.mxu3 %v1086_v20 }
 0x12a   :  { %1102 = vmatpush.msrb.mxu0 %v1085_v21  ;;  %1184 = vmatpush.msrb.mxu3 %v1085_v21 }
 0x12c   :  { %1103 = vmatpush.msrb.mxu0 %v1084_v22  ;;  %1185 = vmatpush.msrb.mxu3 %v1084_v22 }
 0x12e   :  { %1104 = vmatpush.msrb.mxu0 %v1083_v23  ;;  %1186 = vmatpush.msrb.mxu3 %v1083_v23 }
 0x130   :  { %1105 = vmatpush.msrb.mxu0 %v1082_v25  ;;  %1187 = vmatpush.msrb.mxu3 %v1082_v25 }
 0x134   :  { %v840_v26 = vpop.f32.mrf.mxu0 }
 0x135   :  { %v841_v37 = vadd.f32 %v840_v26, %v818_v34  ;;  %v1081_v26 = vld [vmem:[#allocation12 + $0x28] sm:$0xff] }
 0x136   :  { %v863_v29 = vpop.f32.mrf.mxu1  ;;  %1106 = vmatpush.msrb.mxu0 %v1081_v26  ;;  %1188 = vmatpush.msrb.mxu3 %v1081_v26 }
 0x137   :  { %v864_v43 = vadd.f32 %v863_v29, %v841_v37  ;;  %v1080_v29 = vld [vmem:[#allocation12 + $0x20] sm:$0xff] }
 0x138   :  { %1107 = vmatpush.msrb.mxu0 %v1080_v29  ;;  %1189 = vmatpush.msrb.mxu3 %v1080_v29  ;;  %v1076_v37 = vld [vmem:[#allocation12] sm:$0xff] }
 0x13a   :  { %v886_v27 = vpop.f32.mrf.mxu2  ;;  %1108 = vmatpush.msrb.mxu0 %v1079_v31  ;;  %1190 = vmatpush.msrb.mxu3 %v1079_v31 }
 0x13b   :  { %v887_v48 = vadd.f32 %v886_v27, %v864_v43  ;;  %v1131_v43 = vld [vmem:[#allocation15 + $0x50] sm:$0xff] }
 0x13c   :  { %v843_v41 = vpop.f32.mrf.mxu0  ;;  %1109 = vmatpush.msrb.mxu0 %v1078_v35  ;;  %1191 = vmatpush.msrb.mxu3 %v1078_v35 }
 0x13d   :  { %v909_v45 = vpop.f32.mrf.mxu3  ;;  %v844_v50 = vadd.f32 %v843_v41, %v821_v47  ;;  %v1133_v41 = vld [vmem:[#allocation15 + $0x60] sm:$0xff]  ;;  %v1208_v47 = vld [vmem:[#allocation10] ss:$0 sm:$0xff] }
 0x13e   :  { %v910_v52 = vadd.f32 %v909_v45, %v887_v48  ;;  %1110 = vmatpush.msrb.mxu0 %v1077_v36  ;;  %1192 = vmatpush.msrb.mxu3 %v1077_v36  ;;  %v1129_v45 = vld [vmem:[#allocation15 + $0x40] sm:$0xff]  ;;  %v1127_v48 = vld [vmem:[#allocation15 + $0x30] sm:$0xff] }
 0x13f   :  { %v866_v46 = vpop.f32.mrf.mxu1  ;;  %1144 = vmatpush.msrb.mxu1 %v1133_v41 }
 0x140   :  { %v867_v56 = vadd.f32 %v866_v46, %v844_v50  ;;  %1111 = vmatpush.msrb.mxu0 %v1076_v37  ;;  %1193 = vmatpush.msrb.mxu3 %v1076_v37  ;;  %v1128_v46 = vld [vmem:[#allocation15 + $0x38] sm:$0xff] }
 0x143   :  { %v889_v42 = vpop.f32.mrf.mxu2 }
 0x144   :  { %v890_v60 = vadd.f32 %v889_v42, %v867_v56  ;;  %v1132_v42 = vld [vmem:[#allocation15 + $0x58] sm:$0xff] }
 0x145   :  { %v912_v63 = vpop.f32.mrf.mxu3  ;;  %1145 = vmatpush.msrb.mxu1 %v1132_v42 }
 0x146   :  { %v913_v2 = vadd.f32 %v912_v63, %v890_v60  ;;  %v1121_v60 = vld [vmem:[#allocation15] sm:$0xff] }
 0x147   :  { %1146 = vmatpush.msrb.mxu1 %v1131_v43 }
 0x149   :  { %1147 = vmatpush.msrb.mxu1 %v1130_v44 }
 0x14b   :  { %1148 = vmatpush.msrb.mxu1 %v1129_v45 }
 0x14d   :  { %v978_v55 = vpop.f32.mrf.mxu2  ;;  %1149 = vmatpush.msrb.mxu1 %v1128_v46 }
 0x14f   :  { %1150 = vmatpush.msrb.mxu1 %v1127_v48 }
 0x151   :  { %1151 = vmatpush.msrb.mxu1 %v1126_v49 }
 0x155   :  { %v932_v54 = vpop.f32.mrf.mxu0  ;;  %v981_v8 = vpop.f32.mrf.mxu2 }
 0x156   :  { %v933_v57 = vadd.f32 %v932_v54, %v910_v52  ;;  %v1125_v52 = vld [vmem:[#allocation15 + $0x20] sm:$0xff]  ;;  %v1124_v54 = vld [vmem:[#allocation15 + $0x18] sm:$0xff] }
 0x157   :  { %v955_v59 = vpop.f32.mrf.mxu1  ;;  %1152 = vmatpush.msrb.mxu1 %v1125_v52 }
 0x158   :  { %v956_v61 = vadd.f32 %v955_v59, %v933_v57  ;;  %v1122_v59 = vld [vmem:[#allocation15 + $0x8] sm:$0xff] }
 0x159   :  { %1153 = vmatpush.msrb.mxu1 %v1124_v54 }
 0x15a   :  { %v979_v0 = vadd.f32 %v978_v55, %v956_v61  ;;  %v1209_v61 = vld [vmem:[#allocation13] ss:$0 sm:$0xff] }
 0x15b   :  { %1154 = vmatpush.msrb.mxu1 %v1123_v58 }
 0x15c   :  { %v984_v3 = vmax.f32 %v979_v0, 0.0 }
 0x15d   :  { %v935_v5 = vpop.f32.mrf.mxu0  ;;  %1155 = vmatpush.msrb.mxu1 %v1122_v59 }
 0x15e   :  { %v936_v6 = vadd.f32 %v935_v5, %v913_v2  ;;  %1022 = vmatmul.f32.vlgmr.msra.gmra.mxu3 %v984_v3 }
 0x15f   :  { %v958_v7 = vpop.f32.mrf.mxu1  ;;  %1156 = vmatpush.msrb.mxu1 %v1121_v60 }
 0x160   :  { %v959_v9 = vadd.f32 %v958_v7, %v936_v6 }
 0x162   :  { %v982_v10 = vadd.f32 %v981_v8, %v959_v9 }
 0x164   :  { %v985_v11 = vmax.f32 %v982_v10, 0.0 }
 0x166   :  { %1025 = vmatmul.f32.gmra.mxu3 %v985_v11 }
 0x1e1   :  { %v1023_v27 = vpop.f32.mrf.mxu3 }
 0x1e2   :  { %v1024_v28 = vadd.f32 %v1207_v24, %v1023_v27 }
 0x1e4   :  { %v1029_v30 = vmax.f32 %v1024_v28, 0.0 }
 0x1e6   :  { %1067 = vmatmul.f32.vlgmr.msrb.gmra.mxu2 %v1029_v30 }
 0x1e9   :  { %v1026_v32 = vpop.f32.mrf.mxu3 }
 0x1ea   :  { %v1027_v33 = vadd.f32 %v1207_v24, %v1026_v32 }
 0x1ec   :  { %v1030_v34 = vmax.f32 %v1027_v33, 0.0 }
 0x1ee   :  { %1070 = vmatmul.f32.gmra.mxu2 %v1030_v34 }
 0x269   :  { %v1068_v50 = vpop.f32.mrf.mxu2 }
 0x26a   :  { %v1069_v51 = vadd.f32 %v1208_v47, %v1068_v50 }
 0x26c   :  { %v1074_v53 = vmax.f32 %v1069_v51, 0.0 }
 0x26e   :  { %1112 = vmatmul.f32.vlgmr.msrb.gmra.mxu0 %v1074_v53 }
 0x271   :  { %v1071_v55 = vpop.f32.mrf.mxu2 }
 0x272   :  { %v1072_v56 = vadd.f32 %v1208_v47, %v1071_v55 }
 0x274   :  { %v1075_v57 = vmax.f32 %v1072_v56, 0.0 }
 0x276   :  { %1115 = vmatmul.f32.vlgmr.msrb.gmra.mxu3 %v1075_v57 }
 0x2eb   :  { %v1113_v62 = vpop.f32.mrf.mxu0 }
 0x2ec   :  { %v1114_v63 = vadd.f32 %v1209_v61, %v1113_v62 }
 0x2ee   :  { %v1119_v0 = vmax.f32 %v1114_v63, 0.0 }
 0x2f0   :  { %1157 = vmatmul.f32.vlgmr.msrb.gmra.mxu1 %v1119_v0 }
 0x2f9   :  { %v1116_v1 = vpop.f32.mrf.mxu3 }
 0x2fa   :  { %v1117_v2 = vadd.f32 %v1209_v61, %v1116_v1 }
 0x2fc   :  { %v1120_v3 = vmax.f32 %v1117_v2, 0.0 }
 0x2fe   :  { %1160 = vmatmul.f32.gmra.mxu1 %v1120_v3 }
 0x36d   :  { %v1158_v5 = vpop.f32.mrf.mxu1 }
 0x36e   :  { %v1159_v6 = vadd.f32 %v1210_v4, %v1158_v5 }
 0x370   :  { %1164 = vst [vmem:[%s1659_s11] sm:$0xff] %v1159_v6 }
 0x37b   :  { %v1161_v7 = vpop.f32.mrf.mxu1 }
 0x37c   :  { %v1162_v8 = vadd.f32 %v1210_v4, %v1161_v7 }
 0x37e   :  { %1165 = vst [vmem:[%s1659_s11 + $0x8] sm:$0xff] %v1162_v8 }
 0x37f   :  { %1170 = vsyncpa [#allocation3], 1 }
 0x380   :  { %1171 = vsyncpa [#allocation5], 1 }
 0x381   :  { %1172 = vsyncpa [#allocation8], 1 }
 0x382   :  { %1173 = vsyncpa [#allocation11], 1 }
 0x383   :  { %1174 = vsyncpa [#allocation14], 1 }
 0x384   :  { %1175 = vsyncpa [#allocation17], 1 }

</bundles_post_ra>
